<compile_context>
chip_gen: v5e
topology: v5e:2x2
jax: 0.10.0
libtpu: 0.0.40
codegen_flags: <defaults>
</compile_context>

<pallas_src>
import jax
import jax.numpy as jnp
from jax.experimental import pallas as pl

# ---- small, ViT-consistent shapes -------------------------------------------
B, C, IMG, PATCH = 2, 3, 16, 8
P = (IMG // PATCH) ** 2            # 4 patches per image
N = P + 1                          # + cls token (real tokens per image)
N_PAD = 8                          # tokens per image padded to one sublane tile
BN = B * N_PAD                     # rows of the fused token slab
D = 32                             # embed dim
HEADS = 4
HEAD_DIM = D // HEADS
MLP = 4 * D
DEPTH = 2
NUM_CLASSES = 16
PATCH_K = C * PATCH * PATCH        # patch-vector length
EPS_LN = 1e-6                      # timm ViT LayerNorm eps
EPS_NORM = 1e-12                   # F.normalize eps


def _layernorm(v, g, b):
    mu = jnp.mean(v, axis=-1, keepdims=True)
    var = jnp.mean((v - mu) ** 2, axis=-1, keepdims=True)
    return (v - mu) * jax.lax.rsqrt(var + EPS_LN) * g + b


# dot_general "A @ B^T" (contract last dims) -- the standard flash-attn pattern
_DN_T = (((1,), (1,)), ((), ()))


# ---- the single fused forward kernel ----------------------------------------
def _fused_forward_kernel(
        # inputs
        xrows_ref,     # (B*P, PATCH_K)    patch rows
        pw_ref,        # (PATCH_K, D)      patch-embed weight
        scat_ref,      # (BN, B*P)         0/1 scatter of patch rows into slab
        base_ref,      # (BN, D)           cls/pos/patch-bias additive base
        pool_ref,      # (B, BN)           mean-pool matrix (1/P on patch rows)
        attnw_ref,     # (DEPTH, 128, D)   [kT | vT | w_proj | qT*scale] rows
        mlpw_ref,      # (DEPTH, 65, MLP)  [w_fc1 ; w_fc2^T ; b_fc1] rows
        dvec_ref,      # (DEPTH, 8, D)     ln1_g, ln1_b, bq*scale, bproj_eff,
                       #                   ln2_g, ln2_b, b_fc2, 0
        head_ref,      # (40, D)           head_w(pad) ; fc_norm g/b ; head_b(pad)
        # outputs
        fea_ref,       # (B, D)
        out_ref):      # (B, NUM_CLASSES)
    f32 = jnp.float32

    # --- patch embed + token-slab assembly (all whole-tile matmuls) ----------
    ptok = jnp.dot(xrows_ref[...], pw_ref[...], preferred_element_type=f32)
    xf = jnp.dot(scat_ref[...], ptok, preferred_element_type=f32) + base_ref[...]

    # --- block-diagonal attention mask (images independent, pad keys masked) --
    ri = jax.lax.broadcasted_iota(jnp.int32, (BN, BN), 0)
    ci = jax.lax.broadcasted_iota(jnp.int32, (BN, BN), 1)
    same_img = (ri >> 3) == (ci >> 3)                   # N_PAD == 8
    real_key = (ci & (N_PAD - 1)) < N
    neg_mask = jnp.where(jnp.logical_and(same_img, real_key),
                         0.0, -1e30).astype(f32)        # (BN, BN)

    for d in range(DEPTH):                              # unrolled; weights in VMEM
        aw = attnw_ref[d]                               # (128, D)
        dv = dvec_ref[d]                                # (8, D)
        ln1_g, ln1_b = dv[0:1, :], dv[1:2, :]
        bq_s, bproj = dv[2:3, :], dv[3:4, :]
        ln2_g, ln2_b = dv[4:5, :], dv[5:6, :]
        bfc2 = dv[6:7, :]

        # ---------------- attention (pre-norm), batched over images ----------
        h1 = _layernorm(xf, ln1_g, ln1_b)               # (BN, D)
        # K,V head-major: kvT[r, t] = k[t, r] (rows 0:32) / v[t, r] (rows 32:64)
        kvT = jax.lax.dot_general(aw[0:2 * D, :], h1, _DN_T,
                                  preferred_element_type=f32)        # (2D, BN)
        attn_out = jnp.zeros((BN, D), f32)
        for hh in range(HEADS):
            r = hh * HEAD_DIM
            # q per head (scale & q-bias pre-folded into the packed rows)
            q_h = jax.lax.dot_general(h1, aw[96 + r:96 + r + HEAD_DIM, :],
                                      _DN_T, preferred_element_type=f32)
            q_h = q_h + bq_s[:, r:r + HEAD_DIM]                      # (BN, hd)
            s = jnp.dot(q_h, kvT[r:r + HEAD_DIM, :],
                        preferred_element_type=f32) + neg_mask       # (BN, BN)
            p = jax.nn.softmax(s, axis=-1)
            o_h = jax.lax.dot_general(p, kvT[D + r:D + r + HEAD_DIM, :],
                                      _DN_T, preferred_element_type=f32)
            # per-head projection (== concat + w_proj, without the lane concat)
            attn_out = attn_out + jnp.dot(o_h, aw[64 + r:64 + r + HEAD_DIM, :],
                                          preferred_element_type=f32)
        xf = xf + attn_out + bproj

        # ---------------- MLP on the full (BN, D) slab ------------------------
        mw = mlpw_ref[d]                                # (65, MLP)
        h2 = _layernorm(xf, ln2_g, ln2_b)
        h2 = jnp.dot(h2, mw[0:D, :], preferred_element_type=f32) + mw[64:65, :]
        # TODO(synk): PyTorch nn.GELU uses exact erf GELU; erf lowering is not
        # guaranteed in Pallas TPU, so the tanh approximation is used here.
        h2 = jax.nn.gelu(h2, approximate=True)
        xf = xf + jax.lax.dot_general(h2, mw[D:2 * D, :], _DN_T,
                                      preferred_element_type=f32) + bfc2

    # --- head: mean-pool patch tokens, fc_norm, linear, F.normalize ----------
    hp = head_ref[...]                                  # (40, D)
    pooled = jnp.dot(pool_ref[...], xf, preferred_element_type=f32)  # (B, D)
    fea = _layernorm(pooled, hp[D:D + 1, :], hp[D + 1:D + 2, :])
    fea_ref[...] = fea
    logits = jnp.dot(fea, hp[0:D, :], preferred_element_type=f32) + hp[D + 2:D + 3, :]
    sumsq = jnp.sum(logits * logits, axis=-1, keepdims=True)
    out = logits * jax.lax.rsqrt(jnp.maximum(sumsq, EPS_NORM * EPS_NORM))
    out_ref[...] = out[:, :NUM_CLASSES]                 # drop the zero padding


# ---- deterministic parameter init (same layout as the original version) -----
def init_params(key):
    std = 0.02
    ks = jax.random.split(key, 8)
    return {
        "patch_w": jax.random.normal(ks[0], (PATCH_K, D), jnp.float32) * std,
        "patch_b": jnp.zeros((1, D), jnp.float32),
        "cls_token": jax.random.normal(ks[1], (1, D), jnp.float32) * std,
        "pos_embed": jax.random.normal(ks[2], (N, D), jnp.float32) * std,
        "ln1_g": jnp.ones((DEPTH, 1, D), jnp.float32),
        "ln1_b": jnp.zeros((DEPTH, 1, D), jnp.float32),
        "w_qkv": jax.random.normal(ks[3], (DEPTH, D, 3 * D), jnp.float32) * std,
        "b_qkv": jnp.zeros((DEPTH, 1, 3 * D), jnp.float32),
        "w_proj": jax.random.normal(ks[4], (DEPTH, D, D), jnp.float32) * std,
        "b_proj": jnp.zeros((DEPTH, 1, D), jnp.float32),
        "ln2_g": jnp.ones((DEPTH, 1, D), jnp.float32),
        "ln2_b": jnp.zeros((DEPTH, 1, D), jnp.float32),
        "w_fc1": jax.random.normal(ks[5], (DEPTH, D, MLP), jnp.float32) * std,
        "b_fc1": jnp.zeros((DEPTH, 1, MLP), jnp.float32),
        "w_fc2": jax.random.normal(ks[6], (DEPTH, MLP, D), jnp.float32) * std,
        "b_fc2": jnp.zeros((DEPTH, 1, D), jnp.float32),
        "fc_norm_g": jnp.ones((1, D), jnp.float32),
        "fc_norm_b": jnp.zeros((1, D), jnp.float32),
        "head_w": jax.random.normal(ks[7], (D, NUM_CLASSES), jnp.float32) * std,
        "head_b": jnp.zeros((1, NUM_CLASSES), jnp.float32),
    }


# ---- one-time host-side packing into a few aligned operands ------------------
def pack_params(params):
    scale = HEAD_DIM ** -0.5
    cls, pos, pb = params["cls_token"], params["pos_embed"], params["patch_b"]

    # per-image additive base: [cls+pos0 ; pos[1:]+patch_b ; zero pad rows]
    base = jnp.zeros((N_PAD, D), jnp.float32)
    base = base.at[0:1, :].set(cls + pos[0:1, :])
    base = base.at[1:N, :].set(pos[1:N, :] + pb)
    tok_base = jnp.tile(base, (B, 1))                                  # (BN, D)

    # scatter of patch-embed rows into slab rows, and the mean-pool matrix
    rows = (jnp.arange(B)[:, None] * N_PAD + 1 + jnp.arange(P)[None, :]).reshape(-1)
    cols = jnp.arange(B * P)
    scatter = jnp.zeros((BN, B * P), jnp.float32).at[rows, cols].set(1.0)
    pool = jnp.zeros((B, BN), jnp.float32).at[
        jnp.repeat(jnp.arange(B), P), rows].set(1.0 / P)

    attn_w, dvec, mlp_w = [], [], []
    for d in range(DEPTH):
        wqkv, bqkv = params["w_qkv"][d], params["b_qkv"][d]
        wq, wk, wv = wqkv[:, :D], wqkv[:, D:2 * D], wqkv[:, 2 * D:]
        bq, bv = bqkv[:, :D], bqkv[:, 2 * D:]
        wproj, bproj = params["w_proj"][d], params["b_proj"][d]
        # rows: [kT | vT | w_proj | qT * scale]  (all head-major 8-row blocks)
        attn_w.append(jnp.concatenate([wk.T, wv.T, wproj, wq.T * scale], axis=0))
        # k-bias is softmax-invariant (dropped exactly); v-bias folds through
        # attention (softmax rows sum to 1) into the projection bias.
        bproj_eff = bproj + bv @ wproj
        dvec.append(jnp.concatenate(
            [params["ln1_g"][d], params["ln1_b"][d], bq * scale, bproj_eff,
             params["ln2_g"][d], params["ln2_b"][d], params["b_fc2"][d],
             jnp.zeros((1, D), jnp.float32)], axis=0))                 # (8, D)
        mlp_w.append(jnp.concatenate(
            [params["w_fc1"][d], params["w_fc2"][d].T, params["b_fc1"][d]],
            axis=0))                                                   # (65, MLP)

    head_pack = jnp.zeros((40, D), jnp.float32)
    head_pack = head_pack.at[0:D, 0:NUM_CLASSES].set(params["head_w"])
    head_pack = head_pack.at[D:D + 1, :].set(params["fc_norm_g"])
    head_pack = head_pack.at[D + 1:D + 2, :].set(params["fc_norm_b"])
    head_pack = head_pack.at[D + 2:D + 3, 0:NUM_CLASSES].set(params["head_b"])

    return {
        "w_patch": params["patch_w"],
        "scatter": scatter,
        "tok_base": tok_base,
        "pool": pool,
        "attn_w": jnp.stack(attn_w),
        "mlp_w": jnp.stack(mlp_w),
        "dvec": jnp.stack(dvec),
        "head_pack": head_pack,
    }


# ---- forward pass: Emb_mae(img) -> (emb, emb), emb = (fea, normalized_logits)
@jax.jit
def emb_mae_forward(img, packed):
    # patch extraction (tiny XLA layout shuffle): NCHW -> (B*P, C*ph*pw)
    xb = img.reshape(B, C, IMG // PATCH, PATCH, IMG // PATCH, PATCH)
    xb = jnp.transpose(xb, (0, 2, 4, 1, 3, 5)).reshape(B * P, PATCH_K)

    fea, x_norm = pl.pallas_call(
        _fused_forward_kernel,
        out_shape=(jax.ShapeDtypeStruct((B, D), jnp.float32),
                   jax.ShapeDtypeStruct((B, NUM_CLASSES), jnp.float32)),
    )(xb, packed["w_patch"], packed["scatter"], packed["tok_base"],
      packed["pool"], packed["attn_w"], packed["mlp_w"], packed["dvec"],
      packed["head_pack"])

    emb = (fea, x_norm)
    return emb, emb


if __name__ == "__main__":
    key = jax.random.PRNGKey(0)
    k_img, k_par = jax.random.split(key)
    img = jax.random.normal(k_img, (B, C, IMG, IMG), dtype=jnp.float32)
    params = init_params(k_par)
    packed = pack_params(params)

    (emb_a, emb_b) = emb_mae_forward(img, packed)
    fea, x_norm = emb_a
    jax.block_until_ready(fea)
    jax.block_until_ready(x_norm)

    assert fea.shape == (B, D) and x_norm.shape == (B, NUM_CLASSES)
    assert emb_b[0].shape == fea.shape and emb_b[1].shape == x_norm.shape
    # normalized logits should have unit L2 norm along dim=1
    assert bool(jnp.allclose(jnp.linalg.norm(x_norm, axis=1), 1.0, atol=1e-5))
    print("KERNEL_OK")
</pallas_src>

<mosaic_0001>
module attributes {stable_mosaic.version = 11 : i64} {
  func.func @_fused_forward_kernel(%arg0: memref<8x192xf32, #tpu.memory_space<vmem>>, %arg1: memref<192x32xf32, #tpu.memory_space<vmem>>, %arg2: memref<16x8xf32, #tpu.memory_space<vmem>>, %arg3: memref<16x32xf32, #tpu.memory_space<vmem>>, %arg4: memref<2x16xf32, #tpu.memory_space<vmem>>, %arg5: memref<2x128x32xf32, #tpu.memory_space<vmem>>, %arg6: memref<2x65x128xf32, #tpu.memory_space<vmem>>, %arg7: memref<2x8x32xf32, #tpu.memory_space<vmem>>, %arg8: memref<40x32xf32, #tpu.memory_space<vmem>>, %arg9: memref<2x32xf32, #tpu.memory_space<vmem>>, %arg10: memref<2x16xf32, #tpu.memory_space<vmem>>) attributes {dimension_semantics = [], scalar_prefetch = 0 : i64, scratch_operands = 0 : i64, tpu.core_type = #tpu.core_type<tc>} {
    %c0 = arith.constant 0 : index
    %c0_0 = arith.constant 0 : index
    %0 = vector.load %arg0[%c0, %c0_0] : memref<8x192xf32, #tpu.memory_space<vmem>>, vector<8x192xf32>
    %c0_1 = arith.constant 0 : index
    %c0_2 = arith.constant 0 : index
    %1 = vector.load %arg1[%c0_1, %c0_2] : memref<192x32xf32, #tpu.memory_space<vmem>>, vector<192x32xf32>
    %cst = arith.constant dense<0.000000e+00> : vector<8x32xf32>
    %2 = tpu.matmul %0, %1, %cst {dimension_numbers = #tpu.dot_dimension_numbers<[1], [0], [0], [1], [0, 0, 1, 1], [], []>} : vector<8x192xf32>, vector<192x32xf32>, vector<8x32xf32> -> vector<8x32xf32>
    %c0_3 = arith.constant 0 : index
    %c0_4 = arith.constant 0 : index
    %3 = vector.load %arg2[%c0_3, %c0_4] : memref<16x8xf32, #tpu.memory_space<vmem>>, vector<16x8xf32>
    %cst_5 = arith.constant dense<0.000000e+00> : vector<16x32xf32>
    %4 = tpu.matmul %3, %2, %cst_5 {dimension_numbers = #tpu.dot_dimension_numbers<[1], [0], [0], [1], [0, 0, 1, 1], [], []>} : vector<16x8xf32>, vector<8x32xf32>, vector<16x32xf32> -> vector<16x32xf32>
    %c0_6 = arith.constant 0 : index
    %c0_7 = arith.constant 0 : index
    %5 = vector.load %arg3[%c0_6, %c0_7] : memref<16x32xf32, #tpu.memory_space<vmem>>, vector<16x32xf32>
    %6 = arith.addf %4, %5 : vector<16x32xf32>
    %7 = tpu.iota {dimensions = array<i32: 0>} : vector<16x16xi32>
    %8 = tpu.iota {dimensions = array<i32: 1>} : vector<16x16xi32>
    %c3_i32 = arith.constant 3 : i32
    %9 = vector.broadcast %c3_i32 : i32 to vector<16x16xi32>
    %10 = arith.shrsi %7, %9 : vector<16x16xi32>
    %c3_i32_8 = arith.constant 3 : i32
    %11 = vector.broadcast %c3_i32_8 : i32 to vector<16x16xi32>
    %12 = arith.shrsi %8, %11 : vector<16x16xi32>
    %13 = arith.cmpi eq, %10, %12 : vector<16x16xi32>
    %c7_i32 = arith.constant 7 : i32
    %14 = vector.broadcast %c7_i32 : i32 to vector<16x16xi32>
    %15 = arith.andi %8, %14 : vector<16x16xi32>
    %c5_i32 = arith.constant 5 : i32
    %16 = vector.broadcast %c5_i32 : i32 to vector<16x16xi32>
    %17 = arith.cmpi slt, %15, %16 : vector<16x16xi32>
    %18 = arith.andi %13, %17 : vector<16x16xi1>
    %cst_9 = arith.constant 0.000000e+00 : f32
    %cst_10 = arith.constant -1.000000e+30 : f32
    %19 = vector.broadcast %cst_9 : f32 to vector<16x16xf32>
    %20 = vector.broadcast %cst_10 : f32 to vector<16x16xf32>
    %21 = arith.select %18, %19, %20 : vector<16x16xi1>, vector<16x16xf32>
    %c0_11 = arith.constant 0 : index
    %c0_12 = arith.constant 0 : index
    %c0_13 = arith.constant 0 : index
    %22 = vector.load %arg5[%c0_11, %c0_12, %c0_13] : memref<2x128x32xf32, #tpu.memory_space<vmem>>, vector<1x128x32xf32>
    %23 = vector.shape_cast %22 : vector<1x128x32xf32> to vector<128x32xf32>
    %c0_14 = arith.constant 0 : index
    %c0_15 = arith.constant 0 : index
    %c0_16 = arith.constant 0 : index
    %24 = vector.load %arg7[%c0_14, %c0_15, %c0_16] : memref<2x8x32xf32, #tpu.memory_space<vmem>>, vector<1x8x32xf32>
    %25 = vector.shape_cast %24 : vector<1x8x32xf32> to vector<8x32xf32>
    %26 = vector.extract_strided_slice %25 {offsets = [0, 0], sizes = [1, 32], strides = [1, 1]} : vector<8x32xf32> to vector<1x32xf32>
    %27 = vector.extract_strided_slice %25 {offsets = [1, 0], sizes = [1, 32], strides = [1, 1]} : vector<8x32xf32> to vector<1x32xf32>
    %28 = vector.extract_strided_slice %25 {offsets = [2, 0], sizes = [1, 32], strides = [1, 1]} : vector<8x32xf32> to vector<1x32xf32>
    %29 = vector.extract_strided_slice %25 {offsets = [3, 0], sizes = [1, 32], strides = [1, 1]} : vector<8x32xf32> to vector<1x32xf32>
    %30 = vector.extract_strided_slice %25 {offsets = [4, 0], sizes = [1, 32], strides = [1, 1]} : vector<8x32xf32> to vector<1x32xf32>
    %31 = vector.extract_strided_slice %25 {offsets = [5, 0], sizes = [1, 32], strides = [1, 1]} : vector<8x32xf32> to vector<1x32xf32>
    %32 = vector.extract_strided_slice %25 {offsets = [6, 0], sizes = [1, 32], strides = [1, 1]} : vector<8x32xf32> to vector<1x32xf32>
    %cst_17 = arith.constant dense<0.000000e+00> : vector<16xf32>
    %33 = vector.multi_reduction <add>, %6, %cst_17 [1] : vector<16x32xf32> to vector<16xf32>
    %34 = vector.shape_cast %33 : vector<16xf32> to vector<16x1xf32>
    %cst_18 = arith.constant 3.200000e+01 : f32
    %35 = vector.broadcast %cst_18 : f32 to vector<16x1xf32>
    %36 = arith.divf %34, %35 : vector<16x1xf32>
    %37 = vector.broadcast %36 : vector<16x1xf32> to vector<16x32xf32>
    %38 = arith.subf %6, %37 : vector<16x32xf32>
    %39 = arith.mulf %38, %38 : vector<16x32xf32>
    %cst_19 = arith.constant dense<0.000000e+00> : vector<16xf32>
    %40 = vector.multi_reduction <add>, %39, %cst_19 [1] : vector<16x32xf32> to vector<16xf32>
    %41 = vector.shape_cast %40 : vector<16xf32> to vector<16x1xf32>
    %cst_20 = arith.constant 3.200000e+01 : f32
    %42 = vector.broadcast %cst_20 : f32 to vector<16x1xf32>
    %43 = arith.divf %41, %42 : vector<16x1xf32>
    %44 = vector.broadcast %36 : vector<16x1xf32> to vector<16x32xf32>
    %45 = arith.subf %6, %44 : vector<16x32xf32>
    %cst_21 = arith.constant 9.99999997E-7 : f32
    %46 = vector.broadcast %cst_21 : f32 to vector<16x1xf32>
    %47 = arith.addf %43, %46 : vector<16x1xf32>
    %48 = math.rsqrt %47 : vector<16x1xf32>
    %49 = vector.broadcast %48 : vector<16x1xf32> to vector<16x32xf32>
    %50 = arith.mulf %45, %49 : vector<16x32xf32>
    %51 = vector.broadcast %26 : vector<1x32xf32> to vector<16x32xf32>
    %52 = arith.mulf %50, %51 : vector<16x32xf32>
    %53 = vector.broadcast %27 : vector<1x32xf32> to vector<16x32xf32>
    %54 = arith.addf %52, %53 : vector<16x32xf32>
    %55 = vector.extract_strided_slice %23 {offsets = [0, 0], sizes = [64, 32], strides = [1, 1]} : vector<128x32xf32> to vector<64x32xf32>
    %cst_22 = arith.constant dense<0.000000e+00> : vector<64x16xf32>
    %56 = tpu.matmul %55, %54, %cst_22 {dimension_numbers = #tpu.dot_dimension_numbers<[1], [1], [0], [0], [0, 0, 1, 0], [], []>} : vector<64x32xf32>, vector<16x32xf32>, vector<64x16xf32> -> vector<64x16xf32>
    %cst_23 = arith.constant 0.000000e+00 : f32
    %57 = vector.broadcast %cst_23 : f32 to vector<16x32xf32>
    %58 = vector.extract_strided_slice %23 {offsets = [96, 0], sizes = [8, 32], strides = [1, 1]} : vector<128x32xf32> to vector<8x32xf32>
    %cst_24 = arith.constant dense<0.000000e+00> : vector<16x8xf32>
    %59 = tpu.matmul %54, %58, %cst_24 {dimension_numbers = #tpu.dot_dimension_numbers<[1], [1], [0], [0], [0, 0, 1, 0], [], []>} : vector<16x32xf32>, vector<8x32xf32>, vector<16x8xf32> -> vector<16x8xf32>
    %60 = vector.extract_strided_slice %28 {offsets = [0, 0], sizes = [1, 8], strides = [1, 1]} : vector<1x32xf32> to vector<1x8xf32>
    %61 = vector.broadcast %60 : vector<1x8xf32> to vector<16x8xf32>
    %62 = arith.addf %59, %61 : vector<16x8xf32>
    %63 = vector.extract_strided_slice %56 {offsets = [0, 0], sizes = [8, 16], strides = [1, 1]} : vector<64x16xf32> to vector<8x16xf32>
    %cst_25 = arith.constant dense<0.000000e+00> : vector<16x16xf32>
    %64 = tpu.matmul %62, %63, %cst_25 {dimension_numbers = #tpu.dot_dimension_numbers<[1], [0], [0], [1], [0, 0, 1, 1], [], []>} : vector<16x8xf32>, vector<8x16xf32>, vector<16x16xf32> -> vector<16x16xf32>
    %65 = arith.addf %64, %21 : vector<16x16xf32>
    %cst_26 = arith.constant dense<0xFF800000> : vector<16xf32>
    %66 = vector.multi_reduction <maximumf>, %65, %cst_26 [1] : vector<16x16xf32> to vector<16xf32>
    %cst_27 = arith.constant 0xFF800000 : f32
    %67 = vector.broadcast %cst_27 : f32 to vector<16xf32>
    %68 = arith.maximumf %67, %66 : vector<16xf32>
    %69 = vector.shape_cast %68 : vector<16xf32> to vector<16x1xf32>
    %70 = vector.broadcast %69 : vector<16x1xf32> to vector<16x16xf32>
    %71 = arith.subf %65, %70 : vector<16x16xf32>
    %72 = math.exp %71 : vector<16x16xf32>
    %cst_28 = arith.constant dense<0.000000e+00> : vector<16xf32>
    %73 = vector.multi_reduction <add>, %72, %cst_28 [1] : vector<16x16xf32> to vector<16xf32>
    %74 = vector.shape_cast %73 : vector<16xf32> to vector<16x1xf32>
    %75 = vector.broadcast %74 : vector<16x1xf32> to vector<16x16xf32>
    %76 = arith.divf %72, %75 : vector<16x16xf32>
    %77 = vector.extract_strided_slice %56 {offsets = [32, 0], sizes = [8, 16], strides = [1, 1]} : vector<64x16xf32> to vector<8x16xf32>
    %cst_29 = arith.constant dense<0.000000e+00> : vector<16x8xf32>
    %78 = tpu.matmul %76, %77, %cst_29 {dimension_numbers = #tpu.dot_dimension_numbers<[1], [1], [0], [0], [0, 0, 1, 0], [], []>} : vector<16x16xf32>, vector<8x16xf32>, vector<16x8xf32> -> vector<16x8xf32>
    %79 = vector.extract_strided_slice %23 {offsets = [64, 0], sizes = [8, 32], strides = [1, 1]} : vector<128x32xf32> to vector<8x32xf32>
    %cst_30 = arith.constant dense<0.000000e+00> : vector<16x32xf32>
    %80 = tpu.matmul %78, %79, %cst_30 {dimension_numbers = #tpu.dot_dimension_numbers<[1], [0], [0], [1], [0, 0, 1, 1], [], []>} : vector<16x8xf32>, vector<8x32xf32>, vector<16x32xf32> -> vector<16x32xf32>
    %81 = arith.addf %57, %80 : vector<16x32xf32>
    %82 = vector.extract_strided_slice %23 {offsets = [104, 0], sizes = [8, 32], strides = [1, 1]} : vector<128x32xf32> to vector<8x32xf32>
    %cst_31 = arith.constant dense<0.000000e+00> : vector<16x8xf32>
    %83 = tpu.matmul %54, %82, %cst_31 {dimension_numbers = #tpu.dot_dimension_numbers<[1], [1], [0], [0], [0, 0, 1, 0], [], []>} : vector<16x32xf32>, vector<8x32xf32>, vector<16x8xf32> -> vector<16x8xf32>
    %84 = vector.extract_strided_slice %28 {offsets = [0, 8], sizes = [1, 8], strides = [1, 1]} : vector<1x32xf32> to vector<1x8xf32>
    %85 = vector.broadcast %84 : vector<1x8xf32> to vector<16x8xf32>
    %86 = arith.addf %83, %85 : vector<16x8xf32>
    %87 = vector.extract_strided_slice %56 {offsets = [8, 0], sizes = [8, 16], strides = [1, 1]} : vector<64x16xf32> to vector<8x16xf32>
    %cst_32 = arith.constant dense<0.000000e+00> : vector<16x16xf32>
    %88 = tpu.matmul %86, %87, %cst_32 {dimension_numbers = #tpu.dot_dimension_numbers<[1], [0], [0], [1], [0, 0, 1, 1], [], []>} : vector<16x8xf32>, vector<8x16xf32>, vector<16x16xf32> -> vector<16x16xf32>
    %89 = arith.addf %88, %21 : vector<16x16xf32>
    %cst_33 = arith.constant dense<0xFF800000> : vector<16xf32>
    %90 = vector.multi_reduction <maximumf>, %89, %cst_33 [1] : vector<16x16xf32> to vector<16xf32>
    %cst_34 = arith.constant 0xFF800000 : f32
    %91 = vector.broadcast %cst_34 : f32 to vector<16xf32>
    %92 = arith.maximumf %91, %90 : vector<16xf32>
    %93 = vector.shape_cast %92 : vector<16xf32> to vector<16x1xf32>
    %94 = vector.broadcast %93 : vector<16x1xf32> to vector<16x16xf32>
    %95 = arith.subf %89, %94 : vector<16x16xf32>
    %96 = math.exp %95 : vector<16x16xf32>
    %cst_35 = arith.constant dense<0.000000e+00> : vector<16xf32>
    %97 = vector.multi_reduction <add>, %96, %cst_35 [1] : vector<16x16xf32> to vector<16xf32>
    %98 = vector.shape_cast %97 : vector<16xf32> to vector<16x1xf32>
    %99 = vector.broadcast %98 : vector<16x1xf32> to vector<16x16xf32>
    %100 = arith.divf %96, %99 : vector<16x16xf32>
    %101 = vector.extract_strided_slice %56 {offsets = [40, 0], sizes = [8, 16], strides = [1, 1]} : vector<64x16xf32> to vector<8x16xf32>
    %cst_36 = arith.constant dense<0.000000e+00> : vector<16x8xf32>
    %102 = tpu.matmul %100, %101, %cst_36 {dimension_numbers = #tpu.dot_dimension_numbers<[1], [1], [0], [0], [0, 0, 1, 0], [], []>} : vector<16x16xf32>, vector<8x16xf32>, vector<16x8xf32> -> vector<16x8xf32>
    %103 = vector.extract_strided_slice %23 {offsets = [72, 0], sizes = [8, 32], strides = [1, 1]} : vector<128x32xf32> to vector<8x32xf32>
    %cst_37 = arith.constant dense<0.000000e+00> : vector<16x32xf32>
    %104 = tpu.matmul %102, %103, %cst_37 {dimension_numbers = #tpu.dot_dimension_numbers<[1], [0], [0], [1], [0, 0, 1, 1], [], []>} : vector<16x8xf32>, vector<8x32xf32>, vector<16x32xf32> -> vector<16x32xf32>
    %105 = arith.addf %81, %104 : vector<16x32xf32>
    %106 = vector.extract_strided_slice %23 {offsets = [112, 0], sizes = [8, 32], strides = [1, 1]} : vector<128x32xf32> to vector<8x32xf32>
    %cst_38 = arith.constant dense<0.000000e+00> : vector<16x8xf32>
    %107 = tpu.matmul %54, %106, %cst_38 {dimension_numbers = #tpu.dot_dimension_numbers<[1], [1], [0], [0], [0, 0, 1, 0], [], []>} : vector<16x32xf32>, vector<8x32xf32>, vector<16x8xf32> -> vector<16x8xf32>
    %108 = vector.extract_strided_slice %28 {offsets = [0, 16], sizes = [1, 8], strides = [1, 1]} : vector<1x32xf32> to vector<1x8xf32>
    %109 = vector.broadcast %108 : vector<1x8xf32> to vector<16x8xf32>
    %110 = arith.addf %107, %109 : vector<16x8xf32>
    %111 = vector.extract_strided_slice %56 {offsets = [16, 0], sizes = [8, 16], strides = [1, 1]} : vector<64x16xf32> to vector<8x16xf32>
    %cst_39 = arith.constant dense<0.000000e+00> : vector<16x16xf32>
    %112 = tpu.matmul %110, %111, %cst_39 {dimension_numbers = #tpu.dot_dimension_numbers<[1], [0], [0], [1], [0, 0, 1, 1], [], []>} : vector<16x8xf32>, vector<8x16xf32>, vector<16x16xf32> -> vector<16x16xf32>
    %113 = arith.addf %112, %21 : vector<16x16xf32>
    %cst_40 = arith.constant dense<0xFF800000> : vector<16xf32>
    %114 = vector.multi_reduction <maximumf>, %113, %cst_40 [1] : vector<16x16xf32> to vector<16xf32>
    %cst_41 = arith.constant 0xFF800000 : f32
    %115 = vector.broadcast %cst_41 : f32 to vector<16xf32>
    %116 = arith.maximumf %115, %114 : vector<16xf32>
    %117 = vector.shape_cast %116 : vector<16xf32> to vector<16x1xf32>
    %118 = vector.broadcast %117 : vector<16x1xf32> to vector<16x16xf32>
    %119 = arith.subf %113, %118 : vector<16x16xf32>
    %120 = math.exp %119 : vector<16x16xf32>
    %cst_42 = arith.constant dense<0.000000e+00> : vector<16xf32>
    %121 = vector.multi_reduction <add>, %120, %cst_42 [1] : vector<16x16xf32> to vector<16xf32>
    %122 = vector.shape_cast %121 : vector<16xf32> to vector<16x1xf32>
    %123 = vector.broadcast %122 : vector<16x1xf32> to vector<16x16xf32>
    %124 = arith.divf %120, %123 : vector<16x16xf32>
    %125 = vector.extract_strided_slice %56 {offsets = [48, 0], sizes = [8, 16], strides = [1, 1]} : vector<64x16xf32> to vector<8x16xf32>
    %cst_43 = arith.constant dense<0.000000e+00> : vector<16x8xf32>
    %126 = tpu.matmul %124, %125, %cst_43 {dimension_numbers = #tpu.dot_dimension_numbers<[1], [1], [0], [0], [0, 0, 1, 0], [], []>} : vector<16x16xf32>, vector<8x16xf32>, vector<16x8xf32> -> vector<16x8xf32>
    %127 = vector.extract_strided_slice %23 {offsets = [80, 0], sizes = [8, 32], strides = [1, 1]} : vector<128x32xf32> to vector<8x32xf32>
    %cst_44 = arith.constant dense<0.000000e+00> : vector<16x32xf32>
    %128 = tpu.matmul %126, %127, %cst_44 {dimension_numbers = #tpu.dot_dimension_numbers<[1], [0], [0], [1], [0, 0, 1, 1], [], []>} : vector<16x8xf32>, vector<8x32xf32>, vector<16x32xf32> -> vector<16x32xf32>
    %129 = arith.addf %105, %128 : vector<16x32xf32>
    %130 = vector.extract_strided_slice %23 {offsets = [120, 0], sizes = [8, 32], strides = [1, 1]} : vector<128x32xf32> to vector<8x32xf32>
    %cst_45 = arith.constant dense<0.000000e+00> : vector<16x8xf32>
    %131 = tpu.matmul %54, %130, %cst_45 {dimension_numbers = #tpu.dot_dimension_numbers<[1], [1], [0], [0], [0, 0, 1, 0], [], []>} : vector<16x32xf32>, vector<8x32xf32>, vector<16x8xf32> -> vector<16x8xf32>
    %132 = vector.extract_strided_slice %28 {offsets = [0, 24], sizes = [1, 8], strides = [1, 1]} : vector<1x32xf32> to vector<1x8xf32>
    %133 = vector.broadcast %132 : vector<1x8xf32> to vector<16x8xf32>
    %134 = arith.addf %131, %133 : vector<16x8xf32>
    %135 = vector.extract_strided_slice %56 {offsets = [24, 0], sizes = [8, 16], strides = [1, 1]} : vector<64x16xf32> to vector<8x16xf32>
    %cst_46 = arith.constant dense<0.000000e+00> : vector<16x16xf32>
    %136 = tpu.matmul %134, %135, %cst_46 {dimension_numbers = #tpu.dot_dimension_numbers<[1], [0], [0], [1], [0, 0, 1, 1], [], []>} : vector<16x8xf32>, vector<8x16xf32>, vector<16x16xf32> -> vector<16x16xf32>
    %137 = arith.addf %136, %21 : vector<16x16xf32>
    %cst_47 = arith.constant dense<0xFF800000> : vector<16xf32>
    %138 = vector.multi_reduction <maximumf>, %137, %cst_47 [1] : vector<16x16xf32> to vector<16xf32>
    %cst_48 = arith.constant 0xFF800000 : f32
    %139 = vector.broadcast %cst_48 : f32 to vector<16xf32>
    %140 = arith.maximumf %139, %138 : vector<16xf32>
    %141 = vector.shape_cast %140 : vector<16xf32> to vector<16x1xf32>
    %142 = vector.broadcast %141 : vector<16x1xf32> to vector<16x16xf32>
    %143 = arith.subf %137, %142 : vector<16x16xf32>
    %144 = math.exp %143 : vector<16x16xf32>
    %cst_49 = arith.constant dense<0.000000e+00> : vector<16xf32>
    %145 = vector.multi_reduction <add>, %144, %cst_49 [1] : vector<16x16xf32> to vector<16xf32>
    %146 = vector.shape_cast %145 : vector<16xf32> to vector<16x1xf32>
    %147 = vector.broadcast %146 : vector<16x1xf32> to vector<16x16xf32>
    %148 = arith.divf %144, %147 : vector<16x16xf32>
    %149 = vector.extract_strided_slice %56 {offsets = [56, 0], sizes = [8, 16], strides = [1, 1]} : vector<64x16xf32> to vector<8x16xf32>
    %cst_50 = arith.constant dense<0.000000e+00> : vector<16x8xf32>
    %150 = tpu.matmul %148, %149, %cst_50 {dimension_numbers = #tpu.dot_dimension_numbers<[1], [1], [0], [0], [0, 0, 1, 0], [], []>} : vector<16x16xf32>, vector<8x16xf32>, vector<16x8xf32> -> vector<16x8xf32>
    %151 = vector.extract_strided_slice %23 {offsets = [88, 0], sizes = [8, 32], strides = [1, 1]} : vector<128x32xf32> to vector<8x32xf32>
    %cst_51 = arith.constant dense<0.000000e+00> : vector<16x32xf32>
    %152 = tpu.matmul %150, %151, %cst_51 {dimension_numbers = #tpu.dot_dimension_numbers<[1], [0], [0], [1], [0, 0, 1, 1], [], []>} : vector<16x8xf32>, vector<8x32xf32>, vector<16x32xf32> -> vector<16x32xf32>
    %153 = arith.addf %129, %152 : vector<16x32xf32>
    %154 = arith.addf %6, %153 : vector<16x32xf32>
    %155 = vector.broadcast %29 : vector<1x32xf32> to vector<16x32xf32>
    %156 = arith.addf %154, %155 : vector<16x32xf32>
    %c0_52 = arith.constant 0 : index
    %c0_53 = arith.constant 0 : index
    %c0_54 = arith.constant 0 : index
    %157 = vector.load %arg6[%c0_52, %c0_53, %c0_54] : memref<2x65x128xf32, #tpu.memory_space<vmem>>, vector<1x65x128xf32>
    %158 = vector.shape_cast %157 : vector<1x65x128xf32> to vector<65x128xf32>
    %cst_55 = arith.constant dense<0.000000e+00> : vector<16xf32>
    %159 = vector.multi_reduction <add>, %156, %cst_55 [1] : vector<16x32xf32> to vector<16xf32>
    %160 = vector.shape_cast %159 : vector<16xf32> to vector<16x1xf32>
    %cst_56 = arith.constant 3.200000e+01 : f32
    %161 = vector.broadcast %cst_56 : f32 to vector<16x1xf32>
    %162 = arith.divf %160, %161 : vector<16x1xf32>
    %163 = vector.broadcast %162 : vector<16x1xf32> to vector<16x32xf32>
    %164 = arith.subf %156, %163 : vector<16x32xf32>
    %165 = arith.mulf %164, %164 : vector<16x32xf32>
    %cst_57 = arith.constant dense<0.000000e+00> : vector<16xf32>
    %166 = vector.multi_reduction <add>, %165, %cst_57 [1] : vector<16x32xf32> to vector<16xf32>
    %167 = vector.shape_cast %166 : vector<16xf32> to vector<16x1xf32>
    %cst_58 = arith.constant 3.200000e+01 : f32
    %168 = vector.broadcast %cst_58 : f32 to vector<16x1xf32>
    %169 = arith.divf %167, %168 : vector<16x1xf32>
    %170 = vector.broadcast %162 : vector<16x1xf32> to vector<16x32xf32>
    %171 = arith.subf %156, %170 : vector<16x32xf32>
    %cst_59 = arith.constant 9.99999997E-7 : f32
    %172 = vector.broadcast %cst_59 : f32 to vector<16x1xf32>
    %173 = arith.addf %169, %172 : vector<16x1xf32>
    %174 = math.rsqrt %173 : vector<16x1xf32>
    %175 = vector.broadcast %174 : vector<16x1xf32> to vector<16x32xf32>
    %176 = arith.mulf %171, %175 : vector<16x32xf32>
    %177 = vector.broadcast %30 : vector<1x32xf32> to vector<16x32xf32>
    %178 = arith.mulf %176, %177 : vector<16x32xf32>
    %179 = vector.broadcast %31 : vector<1x32xf32> to vector<16x32xf32>
    %180 = arith.addf %178, %179 : vector<16x32xf32>
    %181 = vector.extract_strided_slice %158 {offsets = [0, 0], sizes = [32, 128], strides = [1, 1]} : vector<65x128xf32> to vector<32x128xf32>
    %cst_60 = arith.constant dense<0.000000e+00> : vector<16x128xf32>
    %182 = tpu.matmul %180, %181, %cst_60 {dimension_numbers = #tpu.dot_dimension_numbers<[1], [0], [0], [1], [0, 0, 1, 1], [], []>} : vector<16x32xf32>, vector<32x128xf32>, vector<16x128xf32> -> vector<16x128xf32>
    %183 = vector.extract_strided_slice %158 {offsets = [64, 0], sizes = [1, 128], strides = [1, 1]} : vector<65x128xf32> to vector<1x128xf32>
    %184 = vector.broadcast %183 : vector<1x128xf32> to vector<16x128xf32>
    %185 = arith.addf %182, %184 : vector<16x128xf32>
    %186 = arith.mulf %185, %185 : vector<16x128xf32>
    %187 = arith.mulf %185, %186 : vector<16x128xf32>
    %cst_61 = arith.constant 4.471500e-02 : f32
    %188 = vector.broadcast %cst_61 : f32 to vector<16x128xf32>
    %189 = arith.mulf %188, %187 : vector<16x128xf32>
    %190 = arith.addf %185, %189 : vector<16x128xf32>
    %cst_62 = arith.constant 0.797884583 : f32
    %191 = vector.broadcast %cst_62 : f32 to vector<16x128xf32>
    %192 = arith.mulf %191, %190 : vector<16x128xf32>
    %193 = math.tanh %192 : vector<16x128xf32>
    %cst_63 = arith.constant 1.000000e+00 : f32
    %194 = vector.broadcast %cst_63 : f32 to vector<16x128xf32>
    %195 = arith.addf %194, %193 : vector<16x128xf32>
    %cst_64 = arith.constant 5.000000e-01 : f32
    %196 = vector.broadcast %cst_64 : f32 to vector<16x128xf32>
    %197 = arith.mulf %196, %195 : vector<16x128xf32>
    %198 = arith.mulf %185, %197 : vector<16x128xf32>
    %199 = vector.extract_strided_slice %158 {offsets = [32, 0], sizes = [32, 128], strides = [1, 1]} : vector<65x128xf32> to vector<32x128xf32>
    %cst_65 = arith.constant dense<0.000000e+00> : vector<16x32xf32>
    %200 = tpu.matmul %198, %199, %cst_65 {dimension_numbers = #tpu.dot_dimension_numbers<[1], [1], [0], [0], [0, 0, 1, 0], [], []>} : vector<16x128xf32>, vector<32x128xf32>, vector<16x32xf32> -> vector<16x32xf32>
    %201 = arith.addf %156, %200 : vector<16x32xf32>
    %202 = vector.broadcast %32 : vector<1x32xf32> to vector<16x32xf32>
    %203 = arith.addf %201, %202 : vector<16x32xf32>
    %c1 = arith.constant 1 : index
    %c0_66 = arith.constant 0 : index
    %c0_67 = arith.constant 0 : index
    %204 = vector.load %arg5[%c1, %c0_66, %c0_67] : memref<2x128x32xf32, #tpu.memory_space<vmem>>, vector<1x128x32xf32>
    %205 = vector.shape_cast %204 : vector<1x128x32xf32> to vector<128x32xf32>
    %c1_68 = arith.constant 1 : index
    %c0_69 = arith.constant 0 : index
    %c0_70 = arith.constant 0 : index
    %206 = vector.load %arg7[%c1_68, %c0_69, %c0_70] : memref<2x8x32xf32, #tpu.memory_space<vmem>>, vector<1x8x32xf32>
    %207 = vector.shape_cast %206 : vector<1x8x32xf32> to vector<8x32xf32>
    %208 = vector.extract_strided_slice %207 {offsets = [0, 0], sizes = [1, 32], strides = [1, 1]} : vector<8x32xf32> to vector<1x32xf32>
    %209 = vector.extract_strided_slice %207 {offsets = [1, 0], sizes = [1, 32], strides = [1, 1]} : vector<8x32xf32> to vector<1x32xf32>
    %210 = vector.extract_strided_slice %207 {offsets = [2, 0], sizes = [1, 32], strides = [1, 1]} : vector<8x32xf32> to vector<1x32xf32>
    %211 = vector.extract_strided_slice %207 {offsets = [3, 0], sizes = [1, 32], strides = [1, 1]} : vector<8x32xf32> to vector<1x32xf32>
    %212 = vector.extract_strided_slice %207 {offsets = [4, 0], sizes = [1, 32], strides = [1, 1]} : vector<8x32xf32> to vector<1x32xf32>
    %213 = vector.extract_strided_slice %207 {offsets = [5, 0], sizes = [1, 32], strides = [1, 1]} : vector<8x32xf32> to vector<1x32xf32>
    %214 = vector.extract_strided_slice %207 {offsets = [6, 0], sizes = [1, 32], strides = [1, 1]} : vector<8x32xf32> to vector<1x32xf32>
    %cst_71 = arith.constant dense<0.000000e+00> : vector<16xf32>
    %215 = vector.multi_reduction <add>, %203, %cst_71 [1] : vector<16x32xf32> to vector<16xf32>
    %216 = vector.shape_cast %215 : vector<16xf32> to vector<16x1xf32>
    %cst_72 = arith.constant 3.200000e+01 : f32
    %217 = vector.broadcast %cst_72 : f32 to vector<16x1xf32>
    %218 = arith.divf %216, %217 : vector<16x1xf32>
    %219 = vector.broadcast %218 : vector<16x1xf32> to vector<16x32xf32>
    %220 = arith.subf %203, %219 : vector<16x32xf32>
    %221 = arith.mulf %220, %220 : vector<16x32xf32>
    %cst_73 = arith.constant dense<0.000000e+00> : vector<16xf32>
    %222 = vector.multi_reduction <add>, %221, %cst_73 [1] : vector<16x32xf32> to vector<16xf32>
    %223 = vector.shape_cast %222 : vector<16xf32> to vector<16x1xf32>
    %cst_74 = arith.constant 3.200000e+01 : f32
    %224 = vector.broadcast %cst_74 : f32 to vector<16x1xf32>
    %225 = arith.divf %223, %224 : vector<16x1xf32>
    %226 = vector.broadcast %218 : vector<16x1xf32> to vector<16x32xf32>
    %227 = arith.subf %203, %226 : vector<16x32xf32>
    %cst_75 = arith.constant 9.99999997E-7 : f32
    %228 = vector.broadcast %cst_75 : f32 to vector<16x1xf32>
    %229 = arith.addf %225, %228 : vector<16x1xf32>
    %230 = math.rsqrt %229 : vector<16x1xf32>
    %231 = vector.broadcast %230 : vector<16x1xf32> to vector<16x32xf32>
    %232 = arith.mulf %227, %231 : vector<16x32xf32>
    %233 = vector.broadcast %208 : vector<1x32xf32> to vector<16x32xf32>
    %234 = arith.mulf %232, %233 : vector<16x32xf32>
    %235 = vector.broadcast %209 : vector<1x32xf32> to vector<16x32xf32>
    %236 = arith.addf %234, %235 : vector<16x32xf32>
    %237 = vector.extract_strided_slice %205 {offsets = [0, 0], sizes = [64, 32], strides = [1, 1]} : vector<128x32xf32> to vector<64x32xf32>
    %cst_76 = arith.constant dense<0.000000e+00> : vector<64x16xf32>
    %238 = tpu.matmul %237, %236, %cst_76 {dimension_numbers = #tpu.dot_dimension_numbers<[1], [1], [0], [0], [0, 0, 1, 0], [], []>} : vector<64x32xf32>, vector<16x32xf32>, vector<64x16xf32> -> vector<64x16xf32>
    %cst_77 = arith.constant 0.000000e+00 : f32
    %239 = vector.broadcast %cst_77 : f32 to vector<16x32xf32>
    %240 = vector.extract_strided_slice %205 {offsets = [96, 0], sizes = [8, 32], strides = [1, 1]} : vector<128x32xf32> to vector<8x32xf32>
    %cst_78 = arith.constant dense<0.000000e+00> : vector<16x8xf32>
    %241 = tpu.matmul %236, %240, %cst_78 {dimension_numbers = #tpu.dot_dimension_numbers<[1], [1], [0], [0], [0, 0, 1, 0], [], []>} : vector<16x32xf32>, vector<8x32xf32>, vector<16x8xf32> -> vector<16x8xf32>
    %242 = vector.extract_strided_slice %210 {offsets = [0, 0], sizes = [1, 8], strides = [1, 1]} : vector<1x32xf32> to vector<1x8xf32>
    %243 = vector.broadcast %242 : vector<1x8xf32> to vector<16x8xf32>
    %244 = arith.addf %241, %243 : vector<16x8xf32>
    %245 = vector.extract_strided_slice %238 {offsets = [0, 0], sizes = [8, 16], strides = [1, 1]} : vector<64x16xf32> to vector<8x16xf32>
    %cst_79 = arith.constant dense<0.000000e+00> : vector<16x16xf32>
    %246 = tpu.matmul %244, %245, %cst_79 {dimension_numbers = #tpu.dot_dimension_numbers<[1], [0], [0], [1], [0, 0, 1, 1], [], []>} : vector<16x8xf32>, vector<8x16xf32>, vector<16x16xf32> -> vector<16x16xf32>
    %247 = arith.addf %246, %21 : vector<16x16xf32>
    %cst_80 = arith.constant dense<0xFF800000> : vector<16xf32>
    %248 = vector.multi_reduction <maximumf>, %247, %cst_80 [1] : vector<16x16xf32> to vector<16xf32>
    %cst_81 = arith.constant 0xFF800000 : f32
    %249 = vector.broadcast %cst_81 : f32 to vector<16xf32>
    %250 = arith.maximumf %249, %248 : vector<16xf32>
    %251 = vector.shape_cast %250 : vector<16xf32> to vector<16x1xf32>
    %252 = vector.broadcast %251 : vector<16x1xf32> to vector<16x16xf32>
    %253 = arith.subf %247, %252 : vector<16x16xf32>
    %254 = math.exp %253 : vector<16x16xf32>
    %cst_82 = arith.constant dense<0.000000e+00> : vector<16xf32>
    %255 = vector.multi_reduction <add>, %254, %cst_82 [1] : vector<16x16xf32> to vector<16xf32>
    %256 = vector.shape_cast %255 : vector<16xf32> to vector<16x1xf32>
    %257 = vector.broadcast %256 : vector<16x1xf32> to vector<16x16xf32>
    %258 = arith.divf %254, %257 : vector<16x16xf32>
    %259 = vector.extract_strided_slice %238 {offsets = [32, 0], sizes = [8, 16], strides = [1, 1]} : vector<64x16xf32> to vector<8x16xf32>
    %cst_83 = arith.constant dense<0.000000e+00> : vector<16x8xf32>
    %260 = tpu.matmul %258, %259, %cst_83 {dimension_numbers = #tpu.dot_dimension_numbers<[1], [1], [0], [0], [0, 0, 1, 0], [], []>} : vector<16x16xf32>, vector<8x16xf32>, vector<16x8xf32> -> vector<16x8xf32>
    %261 = vector.extract_strided_slice %205 {offsets = [64, 0], sizes = [8, 32], strides = [1, 1]} : vector<128x32xf32> to vector<8x32xf32>
    %cst_84 = arith.constant dense<0.000000e+00> : vector<16x32xf32>
    %262 = tpu.matmul %260, %261, %cst_84 {dimension_numbers = #tpu.dot_dimension_numbers<[1], [0], [0], [1], [0, 0, 1, 1], [], []>} : vector<16x8xf32>, vector<8x32xf32>, vector<16x32xf32> -> vector<16x32xf32>
    %263 = arith.addf %239, %262 : vector<16x32xf32>
    %264 = vector.extract_strided_slice %205 {offsets = [104, 0], sizes = [8, 32], strides = [1, 1]} : vector<128x32xf32> to vector<8x32xf32>
    %cst_85 = arith.constant dense<0.000000e+00> : vector<16x8xf32>
    %265 = tpu.matmul %236, %264, %cst_85 {dimension_numbers = #tpu.dot_dimension_numbers<[1], [1], [0], [0], [0, 0, 1, 0], [], []>} : vector<16x32xf32>, vector<8x32xf32>, vector<16x8xf32> -> vector<16x8xf32>
    %266 = vector.extract_strided_slice %210 {offsets = [0, 8], sizes = [1, 8], strides = [1, 1]} : vector<1x32xf32> to vector<1x8xf32>
    %267 = vector.broadcast %266 : vector<1x8xf32> to vector<16x8xf32>
    %268 = arith.addf %265, %267 : vector<16x8xf32>
    %269 = vector.extract_strided_slice %238 {offsets = [8, 0], sizes = [8, 16], strides = [1, 1]} : vector<64x16xf32> to vector<8x16xf32>
    %cst_86 = arith.constant dense<0.000000e+00> : vector<16x16xf32>
    %270 = tpu.matmul %268, %269, %cst_86 {dimension_numbers = #tpu.dot_dimension_numbers<[1], [0], [0], [1], [0, 0, 1, 1], [], []>} : vector<16x8xf32>, vector<8x16xf32>, vector<16x16xf32> -> vector<16x16xf32>
    %271 = arith.addf %270, %21 : vector<16x16xf32>
    %cst_87 = arith.constant dense<0xFF800000> : vector<16xf32>
    %272 = vector.multi_reduction <maximumf>, %271, %cst_87 [1] : vector<16x16xf32> to vector<16xf32>
    %cst_88 = arith.constant 0xFF800000 : f32
    %273 = vector.broadcast %cst_88 : f32 to vector<16xf32>
    %274 = arith.maximumf %273, %272 : vector<16xf32>
    %275 = vector.shape_cast %274 : vector<16xf32> to vector<16x1xf32>
    %276 = vector.broadcast %275 : vector<16x1xf32> to vector<16x16xf32>
    %277 = arith.subf %271, %276 : vector<16x16xf32>
    %278 = math.exp %277 : vector<16x16xf32>
    %cst_89 = arith.constant dense<0.000000e+00> : vector<16xf32>
    %279 = vector.multi_reduction <add>, %278, %cst_89 [1] : vector<16x16xf32> to vector<16xf32>
    %280 = vector.shape_cast %279 : vector<16xf32> to vector<16x1xf32>
    %281 = vector.broadcast %280 : vector<16x1xf32> to vector<16x16xf32>
    %282 = arith.divf %278, %281 : vector<16x16xf32>
    %283 = vector.extract_strided_slice %238 {offsets = [40, 0], sizes = [8, 16], strides = [1, 1]} : vector<64x16xf32> to vector<8x16xf32>
    %cst_90 = arith.constant dense<0.000000e+00> : vector<16x8xf32>
    %284 = tpu.matmul %282, %283, %cst_90 {dimension_numbers = #tpu.dot_dimension_numbers<[1], [1], [0], [0], [0, 0, 1, 0], [], []>} : vector<16x16xf32>, vector<8x16xf32>, vector<16x8xf32> -> vector<16x8xf32>
    %285 = vector.extract_strided_slice %205 {offsets = [72, 0], sizes = [8, 32], strides = [1, 1]} : vector<128x32xf32> to vector<8x32xf32>
    %cst_91 = arith.constant dense<0.000000e+00> : vector<16x32xf32>
    %286 = tpu.matmul %284, %285, %cst_91 {dimension_numbers = #tpu.dot_dimension_numbers<[1], [0], [0], [1], [0, 0, 1, 1], [], []>} : vector<16x8xf32>, vector<8x32xf32>, vector<16x32xf32> -> vector<16x32xf32>
    %287 = arith.addf %263, %286 : vector<16x32xf32>
    %288 = vector.extract_strided_slice %205 {offsets = [112, 0], sizes = [8, 32], strides = [1, 1]} : vector<128x32xf32> to vector<8x32xf32>
    %cst_92 = arith.constant dense<0.000000e+00> : vector<16x8xf32>
    %289 = tpu.matmul %236, %288, %cst_92 {dimension_numbers = #tpu.dot_dimension_numbers<[1], [1], [0], [0], [0, 0, 1, 0], [], []>} : vector<16x32xf32>, vector<8x32xf32>, vector<16x8xf32> -> vector<16x8xf32>
    %290 = vector.extract_strided_slice %210 {offsets = [0, 16], sizes = [1, 8], strides = [1, 1]} : vector<1x32xf32> to vector<1x8xf32>
    %291 = vector.broadcast %290 : vector<1x8xf32> to vector<16x8xf32>
    %292 = arith.addf %289, %291 : vector<16x8xf32>
    %293 = vector.extract_strided_slice %238 {offsets = [16, 0], sizes = [8, 16], strides = [1, 1]} : vector<64x16xf32> to vector<8x16xf32>
    %cst_93 = arith.constant dense<0.000000e+00> : vector<16x16xf32>
    %294 = tpu.matmul %292, %293, %cst_93 {dimension_numbers = #tpu.dot_dimension_numbers<[1], [0], [0], [1], [0, 0, 1, 1], [], []>} : vector<16x8xf32>, vector<8x16xf32>, vector<16x16xf32> -> vector<16x16xf32>
    %295 = arith.addf %294, %21 : vector<16x16xf32>
    %cst_94 = arith.constant dense<0xFF800000> : vector<16xf32>
    %296 = vector.multi_reduction <maximumf>, %295, %cst_94 [1] : vector<16x16xf32> to vector<16xf32>
    %cst_95 = arith.constant 0xFF800000 : f32
    %297 = vector.broadcast %cst_95 : f32 to vector<16xf32>
    %298 = arith.maximumf %297, %296 : vector<16xf32>
    %299 = vector.shape_cast %298 : vector<16xf32> to vector<16x1xf32>
    %300 = vector.broadcast %299 : vector<16x1xf32> to vector<16x16xf32>
    %301 = arith.subf %295, %300 : vector<16x16xf32>
    %302 = math.exp %301 : vector<16x16xf32>
    %cst_96 = arith.constant dense<0.000000e+00> : vector<16xf32>
    %303 = vector.multi_reduction <add>, %302, %cst_96 [1] : vector<16x16xf32> to vector<16xf32>
    %304 = vector.shape_cast %303 : vector<16xf32> to vector<16x1xf32>
    %305 = vector.broadcast %304 : vector<16x1xf32> to vector<16x16xf32>
    %306 = arith.divf %302, %305 : vector<16x16xf32>
    %307 = vector.extract_strided_slice %238 {offsets = [48, 0], sizes = [8, 16], strides = [1, 1]} : vector<64x16xf32> to vector<8x16xf32>
    %cst_97 = arith.constant dense<0.000000e+00> : vector<16x8xf32>
    %308 = tpu.matmul %306, %307, %cst_97 {dimension_numbers = #tpu.dot_dimension_numbers<[1], [1], [0], [0], [0, 0, 1, 0], [], []>} : vector<16x16xf32>, vector<8x16xf32>, vector<16x8xf32> -> vector<16x8xf32>
    %309 = vector.extract_strided_slice %205 {offsets = [80, 0], sizes = [8, 32], strides = [1, 1]} : vector<128x32xf32> to vector<8x32xf32>
    %cst_98 = arith.constant dense<0.000000e+00> : vector<16x32xf32>
    %310 = tpu.matmul %308, %309, %cst_98 {dimension_numbers = #tpu.dot_dimension_numbers<[1], [0], [0], [1], [0, 0, 1, 1], [], []>} : vector<16x8xf32>, vector<8x32xf32>, vector<16x32xf32> -> vector<16x32xf32>
    %311 = arith.addf %287, %310 : vector<16x32xf32>
    %312 = vector.extract_strided_slice %205 {offsets = [120, 0], sizes = [8, 32], strides = [1, 1]} : vector<128x32xf32> to vector<8x32xf32>
    %cst_99 = arith.constant dense<0.000000e+00> : vector<16x8xf32>
    %313 = tpu.matmul %236, %312, %cst_99 {dimension_numbers = #tpu.dot_dimension_numbers<[1], [1], [0], [0], [0, 0, 1, 0], [], []>} : vector<16x32xf32>, vector<8x32xf32>, vector<16x8xf32> -> vector<16x8xf32>
    %314 = vector.extract_strided_slice %210 {offsets = [0, 24], sizes = [1, 8], strides = [1, 1]} : vector<1x32xf32> to vector<1x8xf32>
    %315 = vector.broadcast %314 : vector<1x8xf32> to vector<16x8xf32>
    %316 = arith.addf %313, %315 : vector<16x8xf32>
    %317 = vector.extract_strided_slice %238 {offsets = [24, 0], sizes = [8, 16], strides = [1, 1]} : vector<64x16xf32> to vector<8x16xf32>
    %cst_100 = arith.constant dense<0.000000e+00> : vector<16x16xf32>
    %318 = tpu.matmul %316, %317, %cst_100 {dimension_numbers = #tpu.dot_dimension_numbers<[1], [0], [0], [1], [0, 0, 1, 1], [], []>} : vector<16x8xf32>, vector<8x16xf32>, vector<16x16xf32> -> vector<16x16xf32>
    %319 = arith.addf %318, %21 : vector<16x16xf32>
    %cst_101 = arith.constant dense<0xFF800000> : vector<16xf32>
    %320 = vector.multi_reduction <maximumf>, %319, %cst_101 [1] : vector<16x16xf32> to vector<16xf32>
    %cst_102 = arith.constant 0xFF800000 : f32
    %321 = vector.broadcast %cst_102 : f32 to vector<16xf32>
    %322 = arith.maximumf %321, %320 : vector<16xf32>
    %323 = vector.shape_cast %322 : vector<16xf32> to vector<16x1xf32>
    %324 = vector.broadcast %323 : vector<16x1xf32> to vector<16x16xf32>
    %325 = arith.subf %319, %324 : vector<16x16xf32>
    %326 = math.exp %325 : vector<16x16xf32>
    %cst_103 = arith.constant dense<0.000000e+00> : vector<16xf32>
    %327 = vector.multi_reduction <add>, %326, %cst_103 [1] : vector<16x16xf32> to vector<16xf32>
    %328 = vector.shape_cast %327 : vector<16xf32> to vector<16x1xf32>
    %329 = vector.broadcast %328 : vector<16x1xf32> to vector<16x16xf32>
    %330 = arith.divf %326, %329 : vector<16x16xf32>
    %331 = vector.extract_strided_slice %238 {offsets = [56, 0], sizes = [8, 16], strides = [1, 1]} : vector<64x16xf32> to vector<8x16xf32>
    %cst_104 = arith.constant dense<0.000000e+00> : vector<16x8xf32>
    %332 = tpu.matmul %330, %331, %cst_104 {dimension_numbers = #tpu.dot_dimension_numbers<[1], [1], [0], [0], [0, 0, 1, 0], [], []>} : vector<16x16xf32>, vector<8x16xf32>, vector<16x8xf32> -> vector<16x8xf32>
    %333 = vector.extract_strided_slice %205 {offsets = [88, 0], sizes = [8, 32], strides = [1, 1]} : vector<128x32xf32> to vector<8x32xf32>
    %cst_105 = arith.constant dense<0.000000e+00> : vector<16x32xf32>
    %334 = tpu.matmul %332, %333, %cst_105 {dimension_numbers = #tpu.dot_dimension_numbers<[1], [0], [0], [1], [0, 0, 1, 1], [], []>} : vector<16x8xf32>, vector<8x32xf32>, vector<16x32xf32> -> vector<16x32xf32>
    %335 = arith.addf %311, %334 : vector<16x32xf32>
    %336 = arith.addf %203, %335 : vector<16x32xf32>
    %337 = vector.broadcast %211 : vector<1x32xf32> to vector<16x32xf32>
    %338 = arith.addf %336, %337 : vector<16x32xf32>
    %c1_106 = arith.constant 1 : index
    %c0_107 = arith.constant 0 : index
    %c0_108 = arith.constant 0 : index
    %339 = vector.load %arg6[%c1_106, %c0_107, %c0_108] : memref<2x65x128xf32, #tpu.memory_space<vmem>>, vector<1x65x128xf32>
    %340 = vector.shape_cast %339 : vector<1x65x128xf32> to vector<65x128xf32>
    %cst_109 = arith.constant dense<0.000000e+00> : vector<16xf32>
    %341 = vector.multi_reduction <add>, %338, %cst_109 [1] : vector<16x32xf32> to vector<16xf32>
    %342 = vector.shape_cast %341 : vector<16xf32> to vector<16x1xf32>
    %cst_110 = arith.constant 3.200000e+01 : f32
    %343 = vector.broadcast %cst_110 : f32 to vector<16x1xf32>
    %344 = arith.divf %342, %343 : vector<16x1xf32>
    %345 = vector.broadcast %344 : vector<16x1xf32> to vector<16x32xf32>
    %346 = arith.subf %338, %345 : vector<16x32xf32>
    %347 = arith.mulf %346, %346 : vector<16x32xf32>
    %cst_111 = arith.constant dense<0.000000e+00> : vector<16xf32>
    %348 = vector.multi_reduction <add>, %347, %cst_111 [1] : vector<16x32xf32> to vector<16xf32>
    %349 = vector.shape_cast %348 : vector<16xf32> to vector<16x1xf32>
    %cst_112 = arith.constant 3.200000e+01 : f32
    %350 = vector.broadcast %cst_112 : f32 to vector<16x1xf32>
    %351 = arith.divf %349, %350 : vector<16x1xf32>
    %352 = vector.broadcast %344 : vector<16x1xf32> to vector<16x32xf32>
    %353 = arith.subf %338, %352 : vector<16x32xf32>
    %cst_113 = arith.constant 9.99999997E-7 : f32
    %354 = vector.broadcast %cst_113 : f32 to vector<16x1xf32>
    %355 = arith.addf %351, %354 : vector<16x1xf32>
    %356 = math.rsqrt %355 : vector<16x1xf32>
    %357 = vector.broadcast %356 : vector<16x1xf32> to vector<16x32xf32>
    %358 = arith.mulf %353, %357 : vector<16x32xf32>
    %359 = vector.broadcast %212 : vector<1x32xf32> to vector<16x32xf32>
    %360 = arith.mulf %358, %359 : vector<16x32xf32>
    %361 = vector.broadcast %213 : vector<1x32xf32> to vector<16x32xf32>
    %362 = arith.addf %360, %361 : vector<16x32xf32>
    %363 = vector.extract_strided_slice %340 {offsets = [0, 0], sizes = [32, 128], strides = [1, 1]} : vector<65x128xf32> to vector<32x128xf32>
    %cst_114 = arith.constant dense<0.000000e+00> : vector<16x128xf32>
    %364 = tpu.matmul %362, %363, %cst_114 {dimension_numbers = #tpu.dot_dimension_numbers<[1], [0], [0], [1], [0, 0, 1, 1], [], []>} : vector<16x32xf32>, vector<32x128xf32>, vector<16x128xf32> -> vector<16x128xf32>
    %365 = vector.extract_strided_slice %340 {offsets = [64, 0], sizes = [1, 128], strides = [1, 1]} : vector<65x128xf32> to vector<1x128xf32>
    %366 = vector.broadcast %365 : vector<1x128xf32> to vector<16x128xf32>
    %367 = arith.addf %364, %366 : vector<16x128xf32>
    %368 = arith.mulf %367, %367 : vector<16x128xf32>
    %369 = arith.mulf %367, %368 : vector<16x128xf32>
    %cst_115 = arith.constant 4.471500e-02 : f32
    %370 = vector.broadcast %cst_115 : f32 to vector<16x128xf32>
    %371 = arith.mulf %370, %369 : vector<16x128xf32>
    %372 = arith.addf %367, %371 : vector<16x128xf32>
    %cst_116 = arith.constant 0.797884583 : f32
    %373 = vector.broadcast %cst_116 : f32 to vector<16x128xf32>
    %374 = arith.mulf %373, %372 : vector<16x128xf32>
    %375 = math.tanh %374 : vector<16x128xf32>
    %cst_117 = arith.constant 1.000000e+00 : f32
    %376 = vector.broadcast %cst_117 : f32 to vector<16x128xf32>
    %377 = arith.addf %376, %375 : vector<16x128xf32>
    %cst_118 = arith.constant 5.000000e-01 : f32
    %378 = vector.broadcast %cst_118 : f32 to vector<16x128xf32>
    %379 = arith.mulf %378, %377 : vector<16x128xf32>
    %380 = arith.mulf %367, %379 : vector<16x128xf32>
    %381 = vector.extract_strided_slice %340 {offsets = [32, 0], sizes = [32, 128], strides = [1, 1]} : vector<65x128xf32> to vector<32x128xf32>
    %cst_119 = arith.constant dense<0.000000e+00> : vector<16x32xf32>
    %382 = tpu.matmul %380, %381, %cst_119 {dimension_numbers = #tpu.dot_dimension_numbers<[1], [1], [0], [0], [0, 0, 1, 0], [], []>} : vector<16x128xf32>, vector<32x128xf32>, vector<16x32xf32> -> vector<16x32xf32>
    %383 = arith.addf %338, %382 : vector<16x32xf32>
    %384 = vector.broadcast %214 : vector<1x32xf32> to vector<16x32xf32>
    %385 = arith.addf %383, %384 : vector<16x32xf32>
    %c0_120 = arith.constant 0 : index
    %c0_121 = arith.constant 0 : index
    %386 = vector.load %arg8[%c0_120, %c0_121] : memref<40x32xf32, #tpu.memory_space<vmem>>, vector<40x32xf32>
    %c0_122 = arith.constant 0 : index
    %c0_123 = arith.constant 0 : index
    %387 = vector.load %arg4[%c0_122, %c0_123] : memref<2x16xf32, #tpu.memory_space<vmem>>, vector<2x16xf32>
    %cst_124 = arith.constant dense<0.000000e+00> : vector<2x32xf32>
    %388 = tpu.matmul %387, %385, %cst_124 {dimension_numbers = #tpu.dot_dimension_numbers<[1], [0], [0], [1], [0, 0, 1, 1], [], []>} : vector<2x16xf32>, vector<16x32xf32>, vector<2x32xf32> -> vector<2x32xf32>
    %389 = vector.extract_strided_slice %386 {offsets = [32, 0], sizes = [1, 32], strides = [1, 1]} : vector<40x32xf32> to vector<1x32xf32>
    %390 = vector.extract_strided_slice %386 {offsets = [33, 0], sizes = [1, 32], strides = [1, 1]} : vector<40x32xf32> to vector<1x32xf32>
    %cst_125 = arith.constant dense<0.000000e+00> : vector<2xf32>
    %391 = vector.multi_reduction <add>, %388, %cst_125 [1] : vector<2x32xf32> to vector<2xf32>
    %392 = vector.shape_cast %391 : vector<2xf32> to vector<2x1xf32>
    %cst_126 = arith.constant 3.200000e+01 : f32
    %393 = vector.broadcast %cst_126 : f32 to vector<2x1xf32>
    %394 = arith.divf %392, %393 : vector<2x1xf32>
    %395 = vector.broadcast %394 : vector<2x1xf32> to vector<2x32xf32>
    %396 = arith.subf %388, %395 : vector<2x32xf32>
    %397 = arith.mulf %396, %396 : vector<2x32xf32>
    %cst_127 = arith.constant dense<0.000000e+00> : vector<2xf32>
    %398 = vector.multi_reduction <add>, %397, %cst_127 [1] : vector<2x32xf32> to vector<2xf32>
    %399 = vector.shape_cast %398 : vector<2xf32> to vector<2x1xf32>
    %cst_128 = arith.constant 3.200000e+01 : f32
    %400 = vector.broadcast %cst_128 : f32 to vector<2x1xf32>
    %401 = arith.divf %399, %400 : vector<2x1xf32>
    %402 = vector.broadcast %394 : vector<2x1xf32> to vector<2x32xf32>
    %403 = arith.subf %388, %402 : vector<2x32xf32>
    %cst_129 = arith.constant 9.99999997E-7 : f32
    %404 = vector.broadcast %cst_129 : f32 to vector<2x1xf32>
    %405 = arith.addf %401, %404 : vector<2x1xf32>
    %406 = math.rsqrt %405 : vector<2x1xf32>
    %407 = vector.broadcast %406 : vector<2x1xf32> to vector<2x32xf32>
    %408 = arith.mulf %403, %407 : vector<2x32xf32>
    %409 = vector.broadcast %389 : vector<1x32xf32> to vector<2x32xf32>
    %410 = arith.mulf %408, %409 : vector<2x32xf32>
    %411 = vector.broadcast %390 : vector<1x32xf32> to vector<2x32xf32>
    %412 = arith.addf %410, %411 : vector<2x32xf32>
    %c0_130 = arith.constant 0 : index
    %c0_131 = arith.constant 0 : index
    %413 = vector.load %arg9[%c0_130, %c0_131] : memref<2x32xf32, #tpu.memory_space<vmem>>, vector<2x32xf32>
    tpu.vector_store %arg9[%c0_130, %c0_131], %412 {strides = array<i32>} : memref<2x32xf32, #tpu.memory_space<vmem>>, vector<2x32xf32>,
    %414 = vector.extract_strided_slice %386 {offsets = [0, 0], sizes = [32, 32], strides = [1, 1]} : vector<40x32xf32> to vector<32x32xf32>
    %cst_132 = arith.constant dense<0.000000e+00> : vector<2x32xf32>
    %415 = tpu.matmul %412, %414, %cst_132 {dimension_numbers = #tpu.dot_dimension_numbers<[1], [0], [0], [1], [0, 0, 1, 1], [], []>} : vector<2x32xf32>, vector<32x32xf32>, vector<2x32xf32> -> vector<2x32xf32>
    %416 = vector.extract_strided_slice %386 {offsets = [34, 0], sizes = [1, 32], strides = [1, 1]} : vector<40x32xf32> to vector<1x32xf32>
    %417 = vector.broadcast %416 : vector<1x32xf32> to vector<2x32xf32>
    %418 = arith.addf %415, %417 : vector<2x32xf32>
    %419 = arith.mulf %418, %418 : vector<2x32xf32>
    %cst_133 = arith.constant dense<0.000000e+00> : vector<2xf32>
    %420 = vector.multi_reduction <add>, %419, %cst_133 [1] : vector<2x32xf32> to vector<2xf32>
    %421 = vector.shape_cast %420 : vector<2xf32> to vector<2x1xf32>
    %cst_134 = arith.constant 1.000000e-24 : f32
    %422 = vector.broadcast %cst_134 : f32 to vector<2x1xf32>
    %423 = arith.maximumf %421, %422 : vector<2x1xf32>
    %424 = math.rsqrt %423 : vector<2x1xf32>
    %425 = vector.broadcast %424 : vector<2x1xf32> to vector<2x32xf32>
    %426 = arith.mulf %418, %425 : vector<2x32xf32>
    %427 = vector.extract_strided_slice %426 {offsets = [0, 0], sizes = [2, 16], strides = [1, 1]} : vector<2x32xf32> to vector<2x16xf32>
    %c0_135 = arith.constant 0 : index
    %c0_136 = arith.constant 0 : index
    %428 = vector.load %arg10[%c0_135, %c0_136] : memref<2x16xf32, #tpu.memory_space<vmem>>, vector<2x16xf32>
    tpu.vector_store %arg10[%c0_135, %c0_136], %427 {strides = array<i32>} : memref<2x16xf32, #tpu.memory_space<vmem>>, vector<2x16xf32>,
    return
  }
}

</mosaic_0001>

<bundles_post_ra>
// kernel: emb_mae_forward.1
= control target key start
LH: loop header
LB: loop body
LE: loop exit
PB: predicated region body
PF: predicated region fallthrough
CT: control target
= control target key end

     0   :  { %vm60_vm0 = vcmask 523264   ;;  %vm108_vm1 = vcmask 64512   ;;  %vm171_vm2 = vcmask 261120   ;;  %v2407_v39 = vmov 32.0   ;;  %s2408_s15 = smov 120   ;;  %s2410_s28 = smov 112   ;;  %s3109_s1 = inlined_call_operand.vmem [shape: f32[192,32], index: 1, kind: input, shape index: {}]   ;;  %s3110_s0 = inlined_call_operand.vmem [shape: f32[8,192], index: 0, kind: input, shape index: {}]   ;;  %s3111_s2 = inlined_call_operand.vmem [shape: f32[16,8], index: 2, kind: input, shape index: {}]   ;;  %s3112_s3 = inlined_call_operand.vmem [shape: f32[16,32], index: 3, kind: input, shape index: {}]   ;;  %s3113_s5 = inlined_call_operand.vmem [shape: f32[2,128,32], index: 5, kind: input, shape index: {}]   ;;  %s3114_s7 = inlined_call_operand.vmem [shape: f32[2,8,32], index: 7, kind: input, shape index: {}]   ;;  %s3115_s6 = inlined_call_operand.vmem [shape: f32[2,65,128], index: 6, kind: input, shape index: {}]   ;;  %s3116_s4 = inlined_call_operand.vmem [shape: f32[2,16], index: 4, kind: input, shape index: {}]   ;;  %s3117_s8 = inlined_call_operand.vmem [shape: f32[40,32], index: 8, kind: input, shape index: {}]   ;;  %s3118_s9 = inlined_call_operand.vmem [shape: f32[2,32], index: 9, kind: output, shape index: {0}]   ;;  %s3119_s10 = inlined_call_operand.vmem [shape: f32[2,16], index: 10, kind: output, shape index: {1}]  }
   0x1   :  { %v51_v0 = vld [vmem:[%s3109_s1 + $0x78] sm:$0xff]  ;;  %v50_v1 = vld [vmem:[%s3109_s1 + $0x70] sm:$0xff]  ;;  %v49_v2 = vld [vmem:[%s3109_s1 + $0x68] sm:$0xff]  ;;  %2313 = vrcp.f32 %v2407_v39  ;;  %v138_v39 = vlaneseq  ;;  %vm356_vm13 = vcmask 130048   ;;  %s2411_s29 = smov 104  }
   0x2   :  { %64 = vmatpush.msra.mxu0 %v51_v0  ;;  %v59_v3 = vld [vmem:[%s3109_s1 + $0xb8] sm:$0xff]  ;;  %v58_v4 = vld [vmem:[%s3109_s1 + $0xb0] sm:$0xff]  ;;  %v48_v5 = vld [vmem:[%s3109_s1 + $0x60] sm:$0xff] }
   0x3   :  { %92 = vmatpush.msra.mxu1 %v59_v3  ;;  %v57_v6 = vld [vmem:[%s3109_s1 + $0xa8] sm:$0xff]  ;;  %v47_v7 = vld [vmem:[%s3109_s1 + $0x58] sm:$0xff]  ;;  %v56_v8 = vld [vmem:[%s3109_s1 + $0xa0] sm:$0xff] }
   0x4   :  { %65 = vmatpush.msra.mxu0 %v50_v1  ;;  %v46_v9 = vld [vmem:[%s3109_s1 + $0x50] sm:$0xff]  ;;  %v55_v10 = vld [vmem:[%s3109_s1 + $0x98] sm:$0xff]  ;;  %v45_v11 = vld [vmem:[%s3109_s1 + $0x48] sm:$0xff] }
   0x5   :  { %93 = vmatpush.msra.mxu1 %v58_v4  ;;  %v54_v12 = vld [vmem:[%s3109_s1 + $0x90] sm:$0xff]  ;;  %v44_v13 = vld [vmem:[%s3109_s1 + $0x40] sm:$0xff]  ;;  %v53_v14 = vld [vmem:[%s3109_s1 + $0x88] sm:$0xff] }
   0x6   :  { %66 = vmatpush.msra.mxu0 %v49_v2  ;;  %v43_v15 = vld [vmem:[%s3109_s1 + $0x38] sm:$0xff]  ;;  %v52_v16 = vld [vmem:[%s3109_s1 + $0x80] sm:$0xff]  ;;  %v42_v17 = vld [vmem:[%s3109_s1 + $0x30] sm:$0xff] }
   0x7   :  { %94 = vmatpush.msra.mxu1 %v57_v6  ;;  %v35_v18 = vld [vmem:[%s3110_s0 + $0x8] sm:$0xff]  ;;  %v40_v20 = vld [vmem:[%s3109_s1 + $0x20] sm:$0xff]  ;;  %v39_v21 = vld [vmem:[%s3109_s1 + $0x18] sm:$0xff]  ;;  %v2314_v40 = vpop.eup %2313 }
   0x8   :  { %67 = vmatpush.msra.mxu0 %v48_v5  ;;  %v41_v19 = vld [vmem:[%s3109_s1 + $0x28] sm:$0xff]  ;;  %v38_v22 = vld [vmem:[%s3109_s1 + $0x10] sm:$0xff]  ;;  %v36_v24 = vld [vmem:[%s3109_s1] sm:$0xff]  ;;  %v179_v41 = vmul.f32 32.0, %v2314_v40  ;;  %vm183_vm3 = vweird.f32 %v2314_v40 }
   0x9   :  { %95 = vmatpush.msra.mxu1 %v56_v8  ;;  %v37_v23 = vld [vmem:[%s3109_s1 + $0x8] sm:$0xff]  ;;  %v34_v25 = vld [vmem:[%s3110_s0] sm:$0xff] }
   0xa   :  { %68 = vmatpush.msra.mxu0 %v47_v7  ;;  %v104_v29 = vld [vmem:[%s3111_s2] sm:$0xff]  ;;  %v105_v30 = vld [vmem:[%s3111_s2 + $0x8] sm:$0xff]  ;;  %v180_v42 = vsub.f32 1.0, %v179_v41  ;;  %v142_v41 = vand.u32 127, %v138_v39 }
   0xb   :  { %96 = vmatpush.msra.mxu1 %v55_v10  ;;  %v107_v32 = vld [vmem:[%s3112_s3 + $0x8] sm:$0xff]  ;;  %v106_v36 = vld [vmem:[%s3112_s3] sm:$0xff] }
   0xc   :  { %69 = vmatpush.msra.mxu0 %v46_v9  ;;  %v181_v43 = vmul.f32 %v2314_v40, %v180_v42  ;;  %v166_v58 = vld [vmem:[%s3113_s5 + $0x60] sm:$0xff]  ;;  %v167_v59 = vld [vmem:[%s3113_s5 + $0x68] sm:$0xff] }
   0xd   :  { %97 = vmatpush.msra.mxu1 %v54_v12  ;;  %v2588_v3 = vld [vmem:[%s3114_s7] sm:$0xff] }
   0xe   :  { %70 = vmatpush.msra.mxu0 %v45_v11  ;;  %v182_v44 = vadd.f32 %v2314_v40, %v181_v43  ;;  %v2591_v5 = vperm.slane %v2588_v3, 2  ;;  %v223_v10 = vperm.slane %v2588_v3, 0  ;;  %v145_v43 = vshra.s32 %v142_v41, 3 }
   0xf   :  { %98 = vmatpush.msra.mxu1 %v53_v14  ;;  %v226_v14 = vperm.slane %v2588_v3, 1 }
  0x10   :  { %71 = vmatpush.msra.mxu0 %v44_v13  ;;  %v2567_v45 = vsel %vm183_vm3, %v2314_v40, %v182_v44  ;;  %438 = vrot.lane.b32.xlu2 %v2591_v5, %s2408_s15  ;;  %v139_v40 = vshrl.u32 %v138_v39, 7  ;;  %v148_v44 = vand.u32 7, %v142_v41 }
  0x11   :  { %99 = vmatpush.msra.mxu1 %v52_v16 }
  0x12   :  { %72 = vmatpush.msra.mxu0 %v43_v15  ;;  %2171 = vmatmul.msk.f32.vlgmr.msra.gmra.mxu1 %vm60_vm0, %v35_v18  ;;  %v143_v42 = vshra.s32 %v139_v40, 3  ;;  %vm2627_vm11 = vcmp.lt.s32.totalorder %v148_v44, 5 }
  0x14   :  { %73 = vmatpush.msra.mxu0 %v42_v17  ;;  %vm146_vm10 = vcmp.eq.s32.totalorder %v143_v42, %v145_v43 }
  0x15   :  { %vm150_vm12 = vmand %vm146_vm10, %vm2627_vm11 }
  0x16   :  { %74 = vmatpush.msra.mxu0 %v41_v19 }
  0x18   :  { %75 = vmatpush.msra.mxu0 %v40_v20 }
  0x1a   :  { %76 = vmatpush.msra.mxu0 %v39_v21 }
  0x1c   :  { %77 = vmatpush.msra.mxu0 %v38_v22 }
  0x1e   :  { %78 = vmatpush.msra.mxu0 %v37_v23 }
  0x20   :  { %79 = vmatpush.msra.mxu0 %v36_v24  ;;  %v154_v24 = vld [vmem:[%s3113_s5] sm:$0xff] }
  0x21   :  { %80 = vmatmul.f32.vlgmr.msra.gmra.mxu0 %v34_v25  ;;  %v155_v25 = vld [vmem:[%s3113_s5 + $0x8] sm:$0xff] }
  0x22   :  { %2192 = vmatpush.xpose.msk.msrb.mxu0 %vm171_vm2, %v167_v59 }
  0x8f   :  { %v101_v26 = vpop.f32.mrf.mxu1 }
  0x9e   :  { %v81_v27 = vpop.f32.mrf.mxu0 }
  0x9f   :  { %v102_v28 = vadd.f32 %v101_v26, %v81_v27 }
  0xa1   :  { %130 = vmatpush.msra.mxu2 %v102_v28 }
  0xa2   :  { %2172 = vmatmul.msk.f32.vlgmr.msra.gmra.mxu2 %vm108_vm1, %v104_v29 }
  0xa3   :  { %2184 = vmatpush.xpose.msk.msrb.mxu2 %vm171_vm2, %v166_v58 }
  0xaa   :  { %2173 = vmatmul.msk.f32.gmra.mxu2 %vm108_vm1, %v105_v30 }
 0x125   :  { %v132_v31 = vpop.f32.mrf.mxu2 }
 0x126   :  { %v2563_v37 = vadd.f32 %v132_v31, %v106_v36 }
 0x128   :  { %v172_v38 = vsel %vm171_vm2, %v2563_v37, 0.0 }
 0x12d   :  { %v135_v33 = vpop.f32.mrf.mxu2 }
 0x12e   :  { %v2556_v34 = vadd.f32 %v135_v33, %v107_v32  ;;  %v439_v33 = vpop.permute.xlu2 %438 }
 0x130   :  { %v175_v35 = vsel %vm171_vm2, %v2556_v34, 0.0 }
 0x131   :  { %176 = vadd.xlane.f32.xlu0 %v175_v35 }
 0x139   :  { %173 = vadd.xlane.f32.xlu0 %v172_v38 }
 0x1a4   :  { %v177_v46 = vpop.xlane.xlu0 %176 }
 0x1a5   :  { %v186_v47 = vmul.f32 %v2567_v45, %v177_v46 }
 0x1a7   :  { %v188_v48 = vsub.f32 %v2556_v34, %v186_v47  ;;  %v140_v47 = vadd.s32 8, %v139_v40 }
 0x1a9   :  { %v190_v49 = vmul.f32 %v188_v48, %v188_v48 }
 0x1ab   :  { %v194_v50 = vsel %vm171_vm2, %v190_v49, 0.0  ;;  %v156_v49 = vld [vmem:[%s3113_s5 + $0x10] sm:$0xff] }
 0x1ac   :  { %195 = vadd.xlane.f32.xlu1 %v194_v50  ;;  %v174_v51 = vpop.xlane.xlu0 %173  ;;  %v2409_v50 = vmov -1e+30  }
 0x1ad   :  { %v185_v52 = vmul.f32 %v2567_v45, %v174_v51  ;;  %v2637_v51 = vsel %vm150_vm12, 0.0, %v2409_v50 }
 0x1af   :  { %v187_v53 = vsub.f32 %v2563_v37, %v185_v52 }
 0x1b1   :  { %v189_v54 = vmul.f32 %v187_v53, %v187_v53 }
 0x1b3   :  { %v191_v55 = vsel %vm171_vm2, %v189_v54, 0.0 }
 0x1b4   :  { %192 = vadd.xlane.f32.xlu1 %v191_v55 }
 0x21f   :  { %v196_v56 = vpop.xlane.xlu1 %195 }
 0x220   :  { %v198_v57 = vmul.f32 %v196_v56, %v2567_v45 }
 0x222   :  { %v200_v60 = vadd.f32 1e-06, %v198_v57 }
 0x224   :  { %2315 = vrsqrt.f32 %v200_v60  ;;  %vm217_vm5 = vweird.f32 %v200_v60 }
 0x227   :  { %v193_v61 = vpop.xlane.xlu1 %192 }
 0x228   :  { %v197_v62 = vmul.f32 %v193_v61, %v2567_v45 }
 0x22a   :  { %v2316_v63 = vpop.eup %2315  ;;  %v199_v0 = vadd.f32 1e-06, %v197_v62 }
 0x22b   :  { %v212_v1 = vmul.f32 %v2316_v63, %v200_v60  ;;  %vm218_vm4 = vweird.f32 %v2316_v63 }
 0x22c   :  { %2317 = vrsqrt.f32 %v199_v0  ;;  %vm219_vm6 = vmor %vm217_vm5, %vm218_vm4  ;;  %vm207_vm8 = vweird.f32 %v199_v0 }
 0x22d   :  { %v213_v2 = vmul.f32 %v2316_v63, %v212_v1  ;;  %v157_v1 = vld [vmem:[%s3113_s5 + $0x18] sm:$0xff] }
 0x22f   :  { %v214_v4 = vmul.f32 0.5, %v213_v2  ;;  %v158_v2 = vld [vmem:[%s3113_s5 + $0x20] sm:$0xff] }
 0x231   :  { %v215_v6 = vsub.f32 1.5, %v214_v4  ;;  %v159_v4 = vld [vmem:[%s3113_s5 + $0x28] sm:$0xff] }
 0x232   :  { %v2318_v7 = vpop.eup %2317 }
 0x233   :  { %v216_v8 = vmul.f32 %v2316_v63, %v215_v6  ;;  %v202_v9 = vmul.f32 %v2318_v7, %v199_v0  ;;  %vm208_vm7 = vweird.f32 %v2318_v7 }
 0x234   :  { %vm209_vm9 = vmor %vm207_vm8, %vm208_vm7 }
 0x235   :  { %v220_v11 = vsel %vm219_vm6, %v2316_v63, %v216_v8  ;;  %v203_v12 = vmul.f32 %v2318_v7, %v202_v9  ;;  %v163_v9 = vld [vmem:[%s3113_s5 + $0x48] sm:$0xff] }
 0x236   :  { %v222_v13 = vmul.f32 %v220_v11, %v188_v48  ;;  %v144_v48 = vshra.s32 %v140_v47, 3  ;;  %597 = vmatpush.msra.mxu0 %v163_v9 }
 0x237   :  { %v204_v15 = vmul.f32 0.5, %v203_v12 }
 0x238   :  { %v225_v16 = vmul.f32 %v223_v10, %v222_v13  ;;  %vm147_vm14 = vcmp.eq.s32.totalorder %v144_v48, %v145_v43 }
 0x239   :  { %v205_v17 = vsub.f32 1.5, %v204_v15  ;;  %vm151_vm15 = vmand %vm147_vm14, %vm2627_vm11 }
 0x23a   :  { %v2597_v18 = vadd.f32 %v226_v14, %v225_v16  ;;  %v2643_v55 = vsel %vm151_vm15, 0.0, %v2409_v50 }
 0x23b   :  { %v206_v19 = vmul.f32 %v2318_v7, %v205_v17 }
 0x23c   :  { %2174 = vmatpush.xpose.msk.msra.mxu3 %vm171_vm2, %v2597_v18 }
 0x23d   :  { %v210_v20 = vsel %vm209_vm9, %v2318_v7, %v206_v19 }
 0x23e   :  { %v221_v21 = vmul.f32 %v210_v20, %v187_v53 }
 0x240   :  { %v224_v22 = vmul.f32 %v223_v10, %v221_v21 }
 0x242   :  { %v2601_v23 = vadd.f32 %v226_v14, %v224_v22 }
 0x244   :  { %2175 = vmatpush.xpose.msk.msra.mxu3 %vm171_vm2, %v2601_v23  ;;  %2185 = vmatmul.msk.f32.vlgmr.msrb.gmra.mxu2 %vm171_vm2, %v2601_v23 }
 0x245   :  { %2193 = vmatmul.msk.f32.vlgmr.msrb.gmra.mxu0 %vm171_vm2, %v2601_v23 }
 0x247   :  { %2176 = vmatmul.msk.f32.vlgmr.msra.gmra.mxu3 %vm171_vm2, %v154_v24 }
 0x24c   :  { %2186 = vmatmul.msk.f32.gmra.mxu2 %vm171_vm2, %v2597_v18 }
 0x24d   :  { %2194 = vmatmul.msk.f32.gmra.mxu0 %vm171_vm2, %v2597_v18 }
 0x24f   :  { %2177 = vmatmul.msk.f32.gmra.mxu3 %vm171_vm2, %v155_v25 }
 0x257   :  { %2178 = vmatmul.msk.f32.gmra.mxu3 %vm171_vm2, %v156_v49 }
 0x25f   :  { %2179 = vmatmul.msk.f32.gmra.mxu3 %vm171_vm2, %v157_v1 }
 0x267   :  { %2180 = vmatmul.msk.f32.gmra.mxu3 %vm171_vm2, %v158_v2 }
 0x26f   :  { %2181 = vmatmul.msk.f32.gmra.mxu3 %vm171_vm2, %v159_v4 }
 0x2c2   :  { %v461_v32 = vpop.f32.mrf.mxu0 }
 0x2c3   :  { %v462_v35 = vadd.f32 %v461_v32, %v439_v33 }
 0x2c7   :  { %v321_v26 = vpop.f32.mrf.mxu2 }
 0x2c8   :  { %v322_v27 = vadd.f32 %v321_v26, %v2591_v5 }
 0x2ca   :  { %v276_v28 = vpop.f32.mrf.mxu3  ;;  %v464_v36 = vpop.f32.mrf.mxu0 }
 0x2cb   :  { %348 = vmatpush.msrb.mxu1 %v276_v28  ;;  %v465_v38 = vadd.f32 %v464_v36, %v439_v33 }
 0x2cc   :  { %2187 = vmatmul.msk.f32.vlgmr.msrb.gmra.mxu1 %vm108_vm1, %v322_v27 }
 0x2cf   :  { %v324_v29 = vpop.f32.mrf.mxu2 }
 0x2d0   :  { %v325_v30 = vadd.f32 %v324_v29, %v2591_v5 }
 0x2d2   :  { %v279_v31 = vpop.f32.mrf.mxu3 }
 0x2d3   :  { %488 = vmatpush.msra.mxu1 %v279_v31 }
 0x2d4   :  { %2188 = vmatmul.msk.f32.gmra.mxu1 %vm108_vm1, %v325_v30 }
 0x2da   :  { %v282_v29 = vpop.f32.mrf.mxu3 }
 0x2db   :  { %684 = vmatpush.msrb.mxu0 %v282_v29 }
 0x2dc   :  { %2195 = vmatmul.msk.f32.vlgmr.msra.gmra.mxu1 %vm108_vm1, %v462_v35 }
 0x2e2   :  { %v2683_v30 = vpop.f32.mrf.mxu3 }
 0x2e4   :  { %2196 = vmatmul.msk.f32.gmra.mxu1 %vm108_vm1, %v465_v38 }
 0x2ea   :  { %v288_v31 = vpop.f32.mrf.mxu3 }
 0x2eb   :  { %2189 = vmatpush.xpose.msk.msra.mxu2 %vm356_vm13, %v288_v31 }
 0x2f2   :  { %v291_v33 = vpop.f32.mrf.mxu3 }
 0x2f3   :  { %2197 = vmatpush.xpose.msk.msrb.mxu2 %vm356_vm13, %v291_v33 }
 0x349   :  { %v350_v52 = vpop.f32.mrf.mxu1 }
 0x34a   :  { %v351_v53 = vadd.f32 %v350_v52, %v2637_v51 }
 0x34c   :  { %v357_v54 = vsel %vm356_vm13, %v351_v53, -inf }
 0x34d   :  { %358 = vmax.xlane.f32.xlu2 %v357_v54 }
 0x351   :  { %v353_v56 = vpop.f32.mrf.mxu1 }
 0x352   :  { %v354_v57 = vadd.f32 %v353_v56, %v2643_v55 }
 0x354   :  { %v360_v58 = vsel %vm356_vm13, %v354_v57, -inf }
 0x355   :  { %361 = vmax.xlane.f32.xlu0 %v360_v58 }
 0x359   :  { %v490_v59 = vpop.f32.mrf.mxu1 }
 0x35a   :  { %v491_v60 = vadd.f32 %v490_v59, %v2637_v51 }
 0x35c   :  { %v496_v61 = vsel %vm356_vm13, %v491_v60, -inf }
 0x35d   :  { %497 = vmax.xlane.f32.xlu1 %v496_v61 }
 0x361   :  { %v493_v62 = vpop.f32.mrf.mxu1 }
 0x362   :  { %v494_v63 = vadd.f32 %v493_v62, %v2643_v55 }
 0x364   :  { %v499_v0 = vsel %vm356_vm13, %v494_v63, -inf }
 0x365   :  { %500 = vmax.xlane.f32.xlu0 %v499_v0 }
 0x3c0   :  { %v359_v6 = vpop.xlane.xlu2 %358 }
 0x3c1   :  { %v363_v7 = vsub.f32 %v351_v53, %v359_v6  ;;  %v168_v53 = vld [vmem:[%s3113_s5 + $0x70] sm:$0xff] }
 0x3c3   :  { %v365_v8 = vmul.f32 1.442695, %v363_v7 }
 0x3c5   :  { %2319 = vpow2.f32 %v365_v8 }
 0x3c8   :  { %v362_v10 = vpop.xlane.xlu0 %361 }
 0x3c9   :  { %v364_v11 = vsub.f32 %v354_v57, %v362_v10 }
 0x3cb   :  { %v2320_v12 = vpop.eup %2319  ;;  %v367_v13 = vmul.f32 1.442695, %v364_v11 }
 0x3cc   :  { %v369_v14 = vsel %vm356_vm13, %v2320_v12, 0.0 }
 0x3cd   :  { %2321 = vpow2.f32 %v367_v13  ;;  %370 = vadd.xlane.f32.xlu1 %v369_v14 }
 0x3d0   :  { %v498_v15 = vpop.xlane.xlu1 %497 }
 0x3d1   :  { %v502_v16 = vsub.f32 %v491_v60, %v498_v15 }
 0x3d3   :  { %v2667_v17 = vpop.eup %2321  ;;  %v504_v19 = vmul.f32 1.442695, %v502_v16  ;;  %v169_v16 = vld [vmem:[%s3113_s5 + $0x78] sm:$0xff] }
 0x3d4   :  { %v372_v20 = vsel %vm356_vm13, %v2667_v17, 0.0 }
 0x3d5   :  { %2323 = vpow2.f32 %v504_v19  ;;  %373 = vadd.xlane.f32.xlu0 %v372_v20 }
 0x3d8   :  { %v501_v21 = vpop.xlane.xlu0 %500 }
 0x3d9   :  { %v503_v22 = vsub.f32 %v494_v63, %v501_v21 }
 0x3db   :  { %v2671_v24 = vpop.eup %2323  ;;  %v506_v25 = vmul.f32 1.442695, %v503_v22 }
 0x3dc   :  { %v508_v26 = vsel %vm356_vm13, %v2671_v24, 0.0 }
 0x3dd   :  { %2325 = vpow2.f32 %v506_v25  ;;  %509 = vadd.xlane.f32.xlu1 %v508_v26 }
 0x3e3   :  { %v2675_v27 = vpop.eup %2325 }
 0x3e4   :  { %v511_v28 = vsel %vm356_vm13, %v2675_v27, 0.0 }
 0x3e5   :  { %512 = vadd.xlane.f32.xlu0 %v511_v28  ;;  %v162_v28 = vld [vmem:[%s3113_s5 + $0x40] sm:$0xff] }
 0x3e6   :  { %626 = vmatpush.msrb.mxu1 %v162_v28 }
 0x3f6   :  { %634 = vrot.lane.b32.xlu1 %v2591_v5, %s2410_s28 }
 0x3f9   :  { %803 = vrot.lane.b32.xlu0 %v2591_v5, %s2411_s29 }
 0x440   :  { %v371_v32 = vpop.xlane.xlu1 %370 }
 0x441   :  { %2327 = vrcp.f32 %v371_v32  ;;  %v386_v40 = vand.u32 2147483648, %v371_v32  ;;  %v384_v5 = vand.u32 2147483647, %v371_v32  ;;  %vm380_vm3 = vweird.f32 %v371_v32 }
 0x443   :  { %v387_v44 = vor.u32 1.1754944e-38, %v386_v40  ;;  %vm385_vm5 = vcmp.eq.f32.partialorder %v384_v5, 8.507059e+37 }
 0x447   :  { %v2328_v35 = vpop.eup %2327 }
 0x448   :  { %v376_v36 = vmul.f32 %v2328_v35, %v371_v32  ;;  %v374_v38 = vpop.xlane.xlu0 %373  ;;  %vm381_vm0 = vweird.f32 %v2328_v35 }
 0x449   :  { %2329 = vrcp.f32 %v374_v38  ;;  %vm382_vm4 = vmor %vm380_vm3, %vm381_vm0  ;;  %v401_v54 = vand.u32 2147483648, %v374_v38  ;;  %v399_v57 = vand.u32 2147483647, %v374_v38  ;;  %vm395_vm7 = vweird.f32 %v374_v38 }
 0x44a   :  { %v377_v39 = vsub.f32 1.0, %v376_v36 }
 0x44b   :  { %v402_v60 = vor.u32 1.1754944e-38, %v401_v54  ;;  %vm400_vm9 = vcmp.eq.f32.partialorder %v399_v57, 8.507059e+37 }
 0x44c   :  { %v378_v41 = vmul.f32 %v2328_v35, %v377_v39 }
 0x44e   :  { %v379_v42 = vadd.f32 %v2328_v35, %v378_v41 }
 0x44f   :  { %v2330_v43 = vpop.eup %2329 }
 0x450   :  { %v383_v46 = vsel %vm382_vm4, %v2328_v35, %v379_v42  ;;  %v391_v47 = vmul.f32 %v2330_v43, %v374_v38  ;;  %v510_v48 = vpop.xlane.xlu1 %509  ;;  %vm396_vm6 = vweird.f32 %v2330_v43 }
 0x451   :  { %v388_v49 = vsel %vm385_vm5, %v387_v44, %v383_v46  ;;  %2331 = vrcp.f32 %v510_v48  ;;  %vm397_vm8 = vmor %vm395_vm7, %vm396_vm6  ;;  %v525_v4 = vand.u32 2147483648, %v510_v48  ;;  %v523_v7 = vand.u32 2147483647, %v510_v48 }
 0x452   :  { %v392_v50 = vsub.f32 1.0, %v391_v47  ;;  %v389_v52 = vmul.f32 %v2320_v12, %v388_v49  ;;  %vm519_vm11 = vweird.f32 %v510_v48 }
 0x453   :  { %v526_v10 = vor.u32 1.1754944e-38, %v525_v4  ;;  %vm524_vm14 = vcmp.eq.f32.partialorder %v523_v7, 8.507059e+37 }
 0x454   :  { %v393_v56 = vmul.f32 %v2330_v43, %v392_v50  ;;  %2190 = vmatmul.msk.f32.vlgmr.msra.gmra.mxu2 %vm356_vm13, %v389_v52 }
 0x455   :  { %2204 = vmatpush.xpose.msk.msra.mxu2 %vm171_vm2, %v168_v53 }
 0x456   :  { %v394_v58 = vadd.f32 %v2330_v43, %v393_v56 }
 0x457   :  { %v2332_v59 = vpop.eup %2331 }
 0x458   :  { %v515_v61 = vmul.f32 %v2332_v59, %v510_v48  ;;  %v513_v62 = vpop.xlane.xlu0 %512  ;;  %v398_v63 = vsel %vm397_vm8, %v2330_v43, %v394_v58  ;;  %vm520_vm10 = vweird.f32 %v2332_v59 }
 0x459   :  { %2333 = vrcp.f32 %v513_v62  ;;  %v403_v0 = vsel %vm400_vm9, %v402_v60, %v398_v63  ;;  %vm521_vm12 = vmor %vm519_vm11, %vm520_vm10  ;;  %v538_v20 = vand.u32 2147483647, %v513_v62  ;;  %vm534_vm0 = vweird.f32 %v513_v62  ;;  %v160_v60 = vld [vmem:[%s3113_s5 + $0x30] sm:$0xff] }
 0x45a   :  { %v516_v1 = vsub.f32 1.0, %v515_v61  ;;  %v404_v2 = vmul.f32 %v2667_v17, %v403_v0  ;;  %v540_v17 = vand.u32 2147483648, %v513_v62  ;;  %2182 = vmatmul.msk.f32.gmra.mxu3 %vm171_vm2, %v160_v60  ;;  %v161_v61 = vld [vmem:[%s3113_s5 + $0x38] sm:$0xff] }
 0x45b   :  { %vm539_vm4 = vcmp.eq.f32.partialorder %v538_v20, 8.507059e+37 }
 0x45c   :  { %v517_v6 = vmul.f32 %v2332_v59, %v516_v1  ;;  %2191 = vmatmul.msk.f32.gmra.mxu2 %vm356_vm13, %v404_v2  ;;  %v541_v22 = vor.u32 1.1754944e-38, %v540_v17 }
 0x45e   :  { %v518_v8 = vadd.f32 %v2332_v59, %v517_v6 }
 0x45f   :  { %v2334_v9 = vpop.eup %2333 }
 0x460   :  { %v522_v11 = vsel %vm521_vm12, %v2332_v59, %v518_v8  ;;  %v530_v12 = vmul.f32 %v2334_v9, %v513_v62  ;;  %vm535_vm15 = vweird.f32 %v2334_v9 }
 0x461   :  { %v527_v13 = vsel %vm524_vm14, %v526_v10, %v522_v11  ;;  %vm536_vm3 = vmor %vm534_vm0, %vm535_vm15 }
 0x462   :  { %v531_v14 = vsub.f32 1.0, %v530_v12  ;;  %v528_v15 = vmul.f32 %v2671_v24, %v527_v13  ;;  %2183 = vmatmul.msk.f32.gmra.mxu3 %vm171_vm2, %v161_v61 }
 0x464   :  { %v532_v19 = vmul.f32 %v2334_v9, %v531_v14  ;;  %2198 = vmatmul.msk.f32.vlgmr.msrb.gmra.mxu2 %vm356_vm13, %v528_v15 }
 0x465   :  { %2214 = vmatpush.xpose.msk.msrb.mxu2 %vm171_vm2, %v169_v16 }
 0x466   :  { %v533_v21 = vadd.f32 %v2334_v9, %v532_v19 }
 0x468   :  { %v537_v25 = vsel %vm536_vm3, %v2334_v9, %v533_v21 }
 0x469   :  { %v542_v26 = vsel %vm539_vm4, %v541_v22, %v537_v25 }
 0x46a   :  { %v543_v24 = vmul.f32 %v2675_v27, %v542_v26 }
 0x46b   :  { %v804_v38 = vpop.permute.xlu0 %803 }
 0x46c   :  { %2199 = vmatmul.msk.f32.gmra.mxu2 %vm356_vm13, %v543_v24 }
 0x474   :  { %2205 = vmatmul.msk.f32.vlgmr.msra.gmra.mxu2 %vm171_vm2, %v2601_v23 }
 0x47c   :  { %2206 = vmatmul.msk.f32.gmra.mxu2 %vm171_vm2, %v2597_v18 }
 0x484   :  { %2215 = vmatmul.msk.f32.vlgmr.msrb.gmra.mxu2 %vm171_vm2, %v2601_v23 }
 0x48c   :  { %2216 = vmatmul.msk.f32.gmra.mxu2 %vm171_vm2, %v2597_v18  ;;  %v635_v18 = vpop.permute.xlu1 %634 }
 0x4d7   :  { %v431_v27 = vpop.f32.mrf.mxu2 }
 0x4d8   :  { %2202 = vmatmul.msk.f32.vlgmr.msrb.gmra.mxu1 %vm108_vm1, %v431_v27 }
 0x4dd   :  { %v294_v21 = vpop.f32.mrf.mxu3 }
 0x4de   :  { %2209 = vmatpush.xpose.msk.msra.mxu1 %vm356_vm13, %v294_v21 }
 0x4df   :  { %v434_v29 = vpop.f32.mrf.mxu2 }
 0x4e0   :  { %2203 = vmatmul.msk.f32.gmra.mxu1 %vm108_vm1, %v434_v29 }
 0x4e5   :  { %v297_v25 = vpop.f32.mrf.mxu3 }
 0x4e6   :  { %2219 = vmatpush.xpose.msk.msrb.mxu1 %vm356_vm13, %v297_v25 }
 0x4e7   :  { %v570_v31 = vpop.f32.mrf.mxu2 }
 0x4e8   :  { %2200 = vmatmul.msk.f32.vlgmr.msra.gmra.mxu0 %vm108_vm1, %v570_v31 }
 0x4e9   :  { %853 = vmatpush.msra.mxu0 %v2683_v30 }
 0x4ef   :  { %v573_v23 = vpop.f32.mrf.mxu2 }
 0x4f0   :  { %2201 = vmatmul.msk.f32.gmra.mxu0 %vm108_vm1, %v573_v23 }
 0x4f7   :  { %v657_v32 = vpop.f32.mrf.mxu2 }
 0x4f8   :  { %v658_v33 = vadd.f32 %v657_v32, %v635_v18 }
 0x4fa   :  { %2207 = vmatmul.msk.f32.vlgmr.msrb.gmra.mxu0 %vm108_vm1, %v658_v33 }
 0x4ff   :  { %v660_v35 = vpop.f32.mrf.mxu2 }
 0x500   :  { %v661_v36 = vadd.f32 %v660_v35, %v635_v18  ;;  %v164_v18 = vld [vmem:[%s3113_s5 + $0x50] sm:$0xff] }
 0x501   :  { %793 = vmatpush.msrb.mxu3 %v164_v18 }
 0x502   :  { %2208 = vmatmul.msk.f32.gmra.mxu0 %vm108_vm1, %v661_v36 }
 0x507   :  { %v826_v39 = vpop.f32.mrf.mxu2 }
 0x508   :  { %v827_v40 = vadd.f32 %v826_v39, %v804_v38 }
 0x50a   :  { %2217 = vmatmul.msk.f32.vlgmr.msra.gmra.mxu0 %vm108_vm1, %v827_v40 }
 0x50f   :  { %v829_v41 = vpop.f32.mrf.mxu2 }
 0x510   :  { %v830_v5 = vadd.f32 %v829_v41, %v804_v38 }
 0x512   :  { %2218 = vmatmul.msk.f32.gmra.mxu0 %vm108_vm1, %v830_v5 }
 0x555   :  { %v628_v30 = vpop.f32.mrf.mxu1 }
 0x565   :  { %v599_v42 = vpop.f32.mrf.mxu0 }
 0x566   :  { %v2722_v43 = vadd.f32 %v628_v30, %v599_v42 }
 0x56d   :  { %v2724_v44 = vpop.f32.mrf.mxu0 }
 0x577   :  { %v686_v46 = vpop.f32.mrf.mxu0 }
 0x578   :  { %v687_v47 = vadd.f32 %v686_v46, %v2637_v51 }
 0x57a   :  { %v692_v48 = vsel %vm356_vm13, %v687_v47, -inf }
 0x57b   :  { %693 = vmax.xlane.f32.xlu2 %v692_v48 }
 0x57f   :  { %v689_v49 = vpop.f32.mrf.mxu0 }
 0x580   :  { %v690_v50 = vadd.f32 %v689_v49, %v2643_v55 }
 0x582   :  { %v695_v52 = vsel %vm356_vm13, %v690_v50, -inf }
 0x583   :  { %696 = vmax.xlane.f32.xlu2 %v695_v52 }
 0x587   :  { %v855_v53 = vpop.f32.mrf.mxu0 }
 0x588   :  { %v856_v54 = vadd.f32 %v855_v53, %v2637_v51 }
 0x58a   :  { %v861_v56 = vsel %vm356_vm13, %v856_v54, -inf }
 0x58b   :  { %862 = vmax.xlane.f32.xlu1 %v861_v56 }
 0x58f   :  { %v858_v57 = vpop.f32.mrf.mxu0 }
 0x590   :  { %v859_v58 = vadd.f32 %v858_v57, %v2643_v55 }
 0x592   :  { %v864_v59 = vsel %vm356_vm13, %v859_v58, -inf }
 0x593   :  { %865 = vmax.xlane.f32.xlu2 %v864_v59 }
 0x5ee   :  { %v694_v62 = vpop.xlane.xlu2 %693 }
 0x5ef   :  { %v698_v63 = vsub.f32 %v687_v47, %v694_v62 }
 0x5f1   :  { %v700_v0 = vmul.f32 1.442695, %v698_v63 }
 0x5f3   :  { %2335 = vpow2.f32 %v700_v0 }
 0x5f6   :  { %v697_v1 = vpop.xlane.xlu2 %696 }
 0x5f7   :  { %v699_v2 = vsub.f32 %v690_v50, %v697_v1 }
 0x5f9   :  { %v2336_v4 = vpop.eup %2335  ;;  %v702_v6 = vmul.f32 1.442695, %v699_v2 }
 0x5fa   :  { %v704_v7 = vsel %vm356_vm13, %v2336_v4, 0.0 }
 0x5fb   :  { %2337 = vpow2.f32 %v702_v6  ;;  %705 = vadd.xlane.f32.xlu0 %v704_v7 }
 0x5fe   :  { %v863_v8 = vpop.xlane.xlu1 %862 }
 0x5ff   :  { %v867_v9 = vsub.f32 %v856_v54, %v863_v8 }
 0x601   :  { %v2338_v10 = vpop.eup %2337  ;;  %v869_v11 = vmul.f32 1.442695, %v867_v9 }
 0x602   :  { %v707_v12 = vsel %vm356_vm13, %v2338_v10, 0.0 }
 0x603   :  { %2339 = vpow2.f32 %v869_v11  ;;  %708 = vadd.xlane.f32.xlu2 %v707_v12 }
 0x606   :  { %v866_v13 = vpop.xlane.xlu2 %865 }
 0x607   :  { %v868_v14 = vsub.f32 %v859_v58, %v866_v13 }
 0x609   :  { %v2744_v15 = vpop.eup %2339  ;;  %v871_v16 = vmul.f32 1.442695, %v868_v14 }
 0x60a   :  { %v873_v17 = vsel %vm356_vm13, %v2744_v15, 0.0 }
 0x60b   :  { %2341 = vpow2.f32 %v871_v16  ;;  %874 = vadd.xlane.f32.xlu2 %v873_v17  ;;  %v631_v16 = vpop.f32.mrf.mxu1 }
 0x611   :  { %v2748_v19 = vpop.eup %2341 }
 0x612   :  { %v876_v20 = vsel %vm356_vm13, %v2748_v19, 0.0 }
 0x613   :  { %877 = vadd.xlane.f32.xlu2 %v876_v20 }
 0x66e   :  { %v706_v22 = vpop.xlane.xlu0 %705 }
 0x66f   :  { %2343 = vrcp.f32 %v706_v22  ;;  %v721_v29 = vand.u32 2147483648, %v706_v22  ;;  %v719_v23 = vand.u32 2147483647, %v706_v22  ;;  %vm715_vm6 = vweird.f32 %v706_v22 }
 0x671   :  { %v722_v35 = vor.u32 1.1754944e-38, %v721_v29  ;;  %vm720_vm8 = vcmp.eq.f32.partialorder %v719_v23, 8.507059e+37 }
 0x675   :  { %v2344_v26 = vpop.eup %2343 }
 0x676   :  { %v711_v24 = vmul.f32 %v2344_v26, %v706_v22  ;;  %v709_v28 = vpop.xlane.xlu2 %708  ;;  %vm716_vm5 = vweird.f32 %v2344_v26 }
 0x677   :  { %2345 = vrcp.f32 %v709_v28  ;;  %vm717_vm7 = vmor %vm715_vm6, %vm716_vm5  ;;  %v736_v30 = vand.u32 2147483648, %v709_v28  ;;  %v734_v46 = vand.u32 2147483647, %v709_v28  ;;  %vm730_vm10 = vweird.f32 %v709_v28 }
 0x678   :  { %v712_v27 = vsub.f32 1.0, %v711_v24 }
 0x679   :  { %v737_v49 = vor.u32 1.1754944e-38, %v736_v30  ;;  %vm735_vm12 = vcmp.eq.f32.partialorder %v734_v46, 8.507059e+37 }
 0x67a   :  { %v713_v31 = vmul.f32 %v2344_v26, %v712_v27  ;;  %v974_v27 = vperm.slane %v2588_v3, 3 }
 0x67c   :  { %v714_v32 = vadd.f32 %v2344_v26, %v713_v31  ;;  %v632_v31 = vadd.f32 %v631_v16, %v2724_v44 }
 0x67d   :  { %v2346_v33 = vpop.eup %2345 }
 0x67e   :  { %v718_v36 = vsel %vm717_vm7, %v2344_v26, %v714_v32  ;;  %v726_v38 = vmul.f32 %v2346_v33, %v709_v28  ;;  %v875_v39 = vpop.xlane.xlu2 %874  ;;  %vm731_vm9 = vweird.f32 %v2346_v33 }
 0x67f   :  { %v723_v40 = vsel %vm720_vm8, %v722_v35, %v718_v36  ;;  %2347 = vrcp.f32 %v875_v39  ;;  %vm732_vm11 = vmor %vm730_vm10, %vm731_vm9  ;;  %v890_v58 = vand.u32 2147483648, %v875_v39  ;;  %v888_v60 = vand.u32 2147483647, %v875_v39 }
 0x680   :  { %v727_v41 = vsub.f32 1.0, %v726_v38  ;;  %v724_v5 = vmul.f32 %v2336_v4, %v723_v40  ;;  %vm884_vm15 = vweird.f32 %v875_v39 }
 0x681   :  { %v891_v63 = vor.u32 1.1754944e-38, %v890_v58  ;;  %vm889_vm3 = vcmp.eq.f32.partialorder %v888_v60, 8.507059e+37 }
 0x682   :  { %v728_v42 = vmul.f32 %v2346_v33, %v727_v41  ;;  %2210 = vmatmul.msk.f32.vlgmr.msra.gmra.mxu1 %vm356_vm13, %v724_v5 }
 0x684   :  { %v729_v47 = vadd.f32 %v2346_v33, %v728_v42 }
 0x685   :  { %v2348_v48 = vpop.eup %2347 }
 0x686   :  { %v880_v50 = vmul.f32 %v2348_v48, %v875_v39  ;;  %v878_v52 = vpop.xlane.xlu2 %877  ;;  %v733_v53 = vsel %vm732_vm11, %v2346_v33, %v729_v47  ;;  %vm885_vm14 = vweird.f32 %v2348_v48  ;;  %v980_v47 = vld [vmem:[%s3115_s6 + $0x18] sm:$0xff] }
 0x687   :  { %2349 = vrcp.f32 %v878_v52  ;;  %v738_v54 = vsel %vm735_vm12, %v737_v49, %v733_v53  ;;  %vm886_vm0 = vmor %vm884_vm15, %vm885_vm14  ;;  %v905_v7 = vand.u32 2147483648, %v878_v52  ;;  %v903_v9 = vand.u32 2147483647, %v878_v52  ;;  %1055 = vmatpush.msra.mxu2 %v980_v47  ;;  %v978_v49 = vld [vmem:[%s3115_s6 + $0x8] sm:$0xff] }
 0x688   :  { %v881_v56 = vsub.f32 1.0, %v880_v50  ;;  %v739_v57 = vmul.f32 %v2338_v10, %v738_v54  ;;  %vm899_vm5 = vweird.f32 %v878_v52  ;;  %v977_v50 = vld [vmem:[%s3115_s6] sm:$0xff] }
 0x689   :  { %v906_v11 = vor.u32 1.1754944e-38, %v905_v7  ;;  %vm904_vm7 = vcmp.eq.f32.partialorder %v903_v9, 8.507059e+37  ;;  %v1033_v9 = vperm.slane %v2588_v3, 5 }
 0x68a   :  { %v882_v59 = vmul.f32 %v2348_v48, %v881_v56  ;;  %2211 = vmatmul.msk.f32.gmra.mxu1 %vm356_vm13, %v739_v57 }
 0x68c   :  { %v883_v61 = vadd.f32 %v2348_v48, %v882_v59 }
 0x68d   :  { %v2350_v62 = vpop.eup %2349 }
 0x68e   :  { %v887_v0 = vsel %vm886_vm0, %v2348_v48, %v883_v61  ;;  %v895_v1 = vmul.f32 %v2350_v62, %v878_v52  ;;  %vm900_vm4 = vweird.f32 %v2350_v62  ;;  %v979_v48 = vld [vmem:[%s3115_s6 + $0x10] sm:$0xff] }
 0x68f   :  { %v892_v2 = vsel %vm889_vm3, %v891_v63, %v887_v0  ;;  %vm901_vm6 = vmor %vm899_vm5, %vm900_vm4  ;;  %1056 = vmatpush.msra.mxu2 %v979_v48  ;;  %v1109_v48 = vperm.slane %v2588_v3, 6 }
 0x690   :  { %v896_v4 = vsub.f32 1.0, %v895_v1  ;;  %v893_v6 = vmul.f32 %v2744_v15, %v892_v2  ;;  %v165_v15 = vld [vmem:[%s3113_s5 + $0x58] sm:$0xff] }
 0x691   :  { %962 = vmatpush.msra.mxu3 %v165_v15  ;;  %1057 = vmatpush.msra.mxu2 %v978_v49 }
 0x692   :  { %v897_v8 = vmul.f32 %v2350_v62, %v896_v4  ;;  %2220 = vmatmul.msk.f32.vlgmr.msrb.gmra.mxu1 %vm356_vm13, %v893_v6  ;;  %v1030_v4 = vperm.slane %v2588_v3, 4 }
 0x693   :  { %1058 = vmatpush.msra.mxu2 %v977_v50 }
 0x694   :  { %v898_v10 = vadd.f32 %v2350_v62, %v897_v8 }
 0x696   :  { %v902_v12 = vsel %vm901_vm6, %v2350_v62, %v898_v10 }
 0x697   :  { %v907_v13 = vsel %vm904_vm7, %v906_v11, %v902_v12 }
 0x698   :  { %v908_v14 = vmul.f32 %v2748_v19, %v907_v13 }
 0x69a   :  { %2221 = vmatmul.msk.f32.gmra.mxu1 %vm356_vm13, %v908_v14 }
 0x6ff   :  { %v766_v17 = vpop.f32.mrf.mxu1 }
 0x700   :  { %2212 = vmatmul.msk.f32.vlgmr.msrb.gmra.mxu3 %vm108_vm1, %v766_v17 }
 0x707   :  { %v769_v20 = vpop.f32.mrf.mxu1 }
 0x708   :  { %2213 = vmatmul.msk.f32.gmra.mxu3 %vm108_vm1, %v769_v20 }
 0x70f   :  { %v935_v21 = vpop.f32.mrf.mxu1 }
 0x710   :  { %2222 = vmatmul.msk.f32.vlgmr.msra.gmra.mxu3 %vm108_vm1, %v935_v21  ;;  %v984_v21 = vld [vmem:[%s3115_s6 + $0x38] sm:$0xff] }
 0x711   :  { %1096 = vmatpush.xpose.msrb.mxu0 %v984_v21 }
 0x717   :  { %v938_v22 = vpop.f32.mrf.mxu1 }
 0x718   :  { %2223 = vmatmul.msk.f32.gmra.mxu3 %vm108_vm1, %v938_v22  ;;  %v983_v22 = vld [vmem:[%s3115_s6 + $0x30] sm:$0xff] }
 0x719   :  { %1097 = vmatpush.xpose.msrb.mxu0 %v983_v22 }
 0x783   :  { %v795_v19 = vpop.f32.mrf.mxu3 }
 0x784   :  { %v801_v26 = vadd.f32 %v795_v19, %v2722_v43  ;;  %v982_v19 = vld [vmem:[%s3115_s6 + $0x28] sm:$0xff] }
 0x785   :  { %1098 = vmatpush.xpose.msrb.mxu0 %v982_v19 }
 0x78b   :  { %v798_v25 = vpop.f32.mrf.mxu3 }
 0x78c   :  { %v802_v18 = vadd.f32 %v798_v25, %v632_v31  ;;  %v981_v25 = vld [vmem:[%s3115_s6 + $0x20] sm:$0xff] }
 0x78d   :  { %1099 = vmatpush.xpose.msrb.mxu0 %v981_v25 }
 0x793   :  { %v964_v24 = vpop.f32.mrf.mxu3 }
 0x794   :  { %v970_v28 = vadd.f32 %v964_v24, %v801_v26  ;;  %v2311_v26 = vld [vmem:[%s3115_s6 + $0x40] ss:$0 sm:$0xff] }
 0x796   :  { %v972_v29 = vadd.f32 %v970_v28, %v2563_v37 }
 0x798   :  { %v2774_v23 = vadd.f32 %v974_v27, %v972_v29 }
 0x79a   :  { %v986_v32 = vsel %vm171_vm2, %v2774_v23, 0.0 }
 0x79b   :  { %987 = vadd.xlane.f32.xlu2 %v986_v32  ;;  %v967_v33 = vpop.f32.mrf.mxu3 }
 0x79c   :  { %v971_v35 = vadd.f32 %v967_v33, %v802_v18 }
 0x79e   :  { %v973_v36 = vadd.f32 %v971_v35, %v2556_v34 }
 0x7a0   :  { %v2779_v43 = vadd.f32 %v974_v27, %v973_v36 }
 0x7a2   :  { %v989_v38 = vsel %vm171_vm2, %v2779_v43, 0.0 }
 0x7a3   :  { %990 = vadd.xlane.f32.xlu2 %v989_v38 }
 0x80e   :  { %v988_v37 = vpop.xlane.xlu2 %987 }
 0x80f   :  { %v992_v44 = vmul.f32 %v988_v37, %v2567_v45 }
 0x811   :  { %v994_v39 = vsub.f32 %v2774_v23, %v992_v44 }
 0x813   :  { %v996_v40 = vmul.f32 %v994_v39, %v994_v39 }
 0x815   :  { %v998_v41 = vsel %vm171_vm2, %v996_v40, 0.0 }
 0x816   :  { %999 = vadd.xlane.f32.xlu1 %v998_v41  ;;  %v991_v5 = vpop.xlane.xlu2 %990 }
 0x817   :  { %v993_v30 = vmul.f32 %v991_v5, %v2567_v45 }
 0x819   :  { %v995_v34 = vsub.f32 %v2779_v43, %v993_v30 }
 0x81b   :  { %v997_v42 = vmul.f32 %v995_v34, %v995_v34 }
 0x81d   :  { %v1001_v46 = vsel %vm171_vm2, %v997_v42, 0.0 }
 0x81e   :  { %1002 = vadd.xlane.f32.xlu0 %v1001_v46 }
 0x889   :  { %v1000_v52 = vpop.xlane.xlu1 %999 }
 0x88a   :  { %v1004_v53 = vmul.f32 %v1000_v52, %v2567_v45 }
 0x88c   :  { %v1006_v54 = vadd.f32 1e-06, %v1004_v53 }
 0x88e   :  { %2351 = vrsqrt.f32 %v1006_v54  ;;  %vm1014_vm9 = vweird.f32 %v1006_v54 }
 0x891   :  { %v1003_v56 = vpop.xlane.xlu0 %1002 }
 0x892   :  { %v1005_v57 = vmul.f32 %v1003_v56, %v2567_v45 }
 0x894   :  { %v2352_v58 = vpop.eup %2351  ;;  %v1007_v59 = vadd.f32 1e-06, %v1005_v57 }
 0x895   :  { %v1009_v60 = vmul.f32 %v2352_v58, %v1006_v54  ;;  %vm1015_vm8 = vweird.f32 %v2352_v58 }
 0x896   :  { %2353 = vrsqrt.f32 %v1007_v59  ;;  %vm1016_vm10 = vmor %vm1014_vm9, %vm1015_vm8  ;;  %vm1024_vm12 = vweird.f32 %v1007_v59 }
 0x897   :  { %v1010_v61 = vmul.f32 %v2352_v58, %v1009_v60 }
 0x899   :  { %v1011_v62 = vmul.f32 0.5, %v1010_v61 }
 0x89b   :  { %v1012_v63 = vsub.f32 1.5, %v1011_v62 }
 0x89c   :  { %v2354_v0 = vpop.eup %2353 }
 0x89d   :  { %v1013_v1 = vmul.f32 %v2352_v58, %v1012_v63  ;;  %v1019_v2 = vmul.f32 %v2354_v0, %v1007_v59  ;;  %vm1025_vm11 = vweird.f32 %v2354_v0 }
 0x89e   :  { %vm1026_vm14 = vmor %vm1024_vm12, %vm1025_vm11 }
 0x89f   :  { %v1017_v6 = vsel %vm1016_vm10, %v2352_v58, %v1013_v1  ;;  %v1020_v7 = vmul.f32 %v2354_v0, %v1019_v2  ;;  %v2238_v2 = vld [vmem:[%s3113_s5 + $0xe0] sm:$0xff] }
 0x8a0   :  { %v1028_v8 = vmul.f32 %v1017_v6, %v994_v39  ;;  %2253 = vmatpush.xpose.msk.msrb.mxu3 %vm171_vm2, %v2238_v2 }
 0x8a1   :  { %v1021_v10 = vmul.f32 0.5, %v1020_v7 }
 0x8a2   :  { %v1031_v11 = vmul.f32 %v1030_v4, %v1028_v8 }
 0x8a3   :  { %v1022_v12 = vsub.f32 1.5, %v1021_v10  ;;  %v2239_v10 = vld [vmem:[%s3113_s5 + $0xe8] sm:$0xff] }
 0x8a4   :  { %v1034_v13 = vadd.f32 %v1033_v9, %v1031_v11  ;;  %2261 = vmatpush.xpose.msk.msra.mxu3 %vm171_vm2, %v2239_v10 }
 0x8a5   :  { %v1023_v14 = vmul.f32 %v2354_v0, %v1022_v12 }
 0x8a6   :  { %2224 = vmatmul.msk.f32.vlgmr.msra.gmra.mxu2 %vm171_vm2, %v1034_v13 }
 0x8a7   :  { %v1027_v15 = vsel %vm1026_vm14, %v2354_v0, %v1023_v14 }
 0x8a8   :  { %v1029_v16 = vmul.f32 %v1027_v15, %v995_v34 }
 0x8aa   :  { %v1032_v17 = vmul.f32 %v1030_v4, %v1029_v16  ;;  %v2852_v16 = vld [vmem:[%s3114_s7 + $0x8] sm:$0xff] }
 0x8ab   :  { %v1175_v19 = vperm.slane %v2852_v16, 0 }
 0x8ac   :  { %v1035_v20 = vadd.f32 %v1033_v9, %v1032_v17 }
 0x8ae   :  { %2225 = vmatmul.msk.f32.gmra.mxu2 %vm171_vm2, %v1035_v20 }
 0x929   :  { %v1060_v24 = vpop.f32.mrf.mxu2 }
 0x92a   :  { %v1061_v28 = vadd.f32 %v2311_v26, %v1060_v24 }
 0x92c   :  { %v1066_v27 = vmul.f32 %v1061_v28, %v1061_v28 }
 0x92e   :  { %v1068_v29 = vmul.f32 %v1066_v27, %v1061_v28 }
 0x930   :  { %v1070_v31 = vmul.f32 0.044715, %v1068_v29 }
 0x931   :  { %v1063_v18 = vpop.f32.mrf.mxu2 }
 0x932   :  { %v1072_v32 = vadd.f32 %v1070_v31, %v1061_v28  ;;  %v1064_v33 = vadd.f32 %v2311_v26, %v1063_v18 }
 0x934   :  { %v1074_v35 = vmul.f32 0.7978846, %v1072_v32  ;;  %v1067_v36 = vmul.f32 %v1064_v33, %v1064_v33 }
 0x936   :  { %2355 = vtanh.f32 %v1074_v35  ;;  %v1069_v38 = vmul.f32 %v1067_v36, %v1064_v33 }
 0x938   :  { %v1071_v37 = vmul.f32 0.044715, %v1069_v38 }
 0x93a   :  { %v1073_v44 = vadd.f32 %v1071_v37, %v1064_v33 }
 0x93c   :  { %v2356_v39 = vpop.eup %2355  ;;  %v1075_v40 = vmul.f32 0.7978846, %v1073_v44  ;;  %v2226_v44 = vld [vmem:[%s3113_s5 + $0x80] sm:$0xff] }
 0x93d   :  { %v1078_v41 = vadd.f32 1.0, %v2356_v39  ;;  %v2227_v39 = vld [vmem:[%s3113_s5 + $0x88] sm:$0xff] }
 0x93e   :  { %2357 = vtanh.f32 %v1075_v40  ;;  %v2228_v40 = vld [vmem:[%s3113_s5 + $0x90] sm:$0xff] }
 0x93f   :  { %v1080_v5 = vmul.f32 0.5, %v1078_v41  ;;  %v2229_v41 = vld [vmem:[%s3113_s5 + $0x98] sm:$0xff] }
 0x941   :  { %v1082_v30 = vmul.f32 %v1080_v5, %v1061_v28  ;;  %v1178_v28 = vperm.slane %v2852_v16, 1  ;;  %v2241_v5 = vld [vmem:[%s3113_s5 + $0xf8] sm:$0xff] }
 0x943   :  { %1100 = vmatmul.f32.vlgmr.msrb.gmra.mxu0 %v1082_v30  ;;  %v2230_v30 = vld [vmem:[%s3113_s5 + $0xa0] sm:$0xff] }
 0x944   :  { %v2358_v34 = vpop.eup %2357 }
 0x945   :  { %v1079_v42 = vadd.f32 1.0, %v2358_v34  ;;  %v2231_v34 = vld [vmem:[%s3113_s5 + $0xa8] sm:$0xff] }
 0x947   :  { %v1081_v46 = vmul.f32 0.5, %v1079_v42  ;;  %v2232_v42 = vld [vmem:[%s3113_s5 + $0xb0] sm:$0xff] }
 0x949   :  { %v1083_v47 = vmul.f32 %v1081_v46, %v1064_v33  ;;  %v2859_v33 = vperm.slane %v2852_v16, 2  ;;  %v2233_v46 = vld [vmem:[%s3113_s5 + $0xb8] sm:$0xff] }
 0x94b   :  { %1103 = vmatmul.f32.gmra.mxu0 %v1083_v47 }
 0x9c0   :  { %v1101_v49 = vpop.f32.mrf.mxu0 }
 0x9c1   :  { %v1107_v50 = vadd.f32 %v1101_v49, %v2774_v23 }
 0x9c3   :  { %v2824_v52 = vadd.f32 %v1109_v48, %v1107_v50 }
 0x9c5   :  { %v1131_v53 = vsel %vm171_vm2, %v2824_v52, 0.0 }
 0x9c6   :  { %1132 = vadd.xlane.f32.xlu2 %v1131_v53 }
 0x9c8   :  { %v1104_v54 = vpop.f32.mrf.mxu0 }
 0x9c9   :  { %v1108_v56 = vadd.f32 %v1104_v54, %v2779_v43 }
 0x9cb   :  { %v2829_v57 = vadd.f32 %v1109_v48, %v1108_v56 }
 0x9cd   :  { %v1134_v58 = vsel %vm171_vm2, %v2829_v57, 0.0 }
 0x9ce   :  { %1135 = vadd.xlane.f32.xlu1 %v1134_v58 }
 0x9e7   :  { %1389 = vrot.lane.b32.xlu1 %v2859_v33, %s2408_s15 }
 0xa39   :  { %v1133_v59 = vpop.xlane.xlu2 %1132 }
 0xa3a   :  { %v1137_v3 = vmul.f32 %v1133_v59, %v2567_v45 }
 0xa3c   :  { %v1139_v23 = vsub.f32 %v2824_v52, %v1137_v3 }
 0xa3e   :  { %v1141_v60 = vmul.f32 %v1139_v23, %v1139_v23 }
 0xa40   :  { %v1143_v61 = vsel %vm171_vm2, %v1141_v60, 0.0 }
 0xa41   :  { %v1136_v62 = vpop.xlane.xlu1 %1135  ;;  %1144 = vadd.xlane.f32.xlu0 %v1143_v61 }
 0xa42   :  { %v1138_v63 = vmul.f32 %v1136_v62, %v2567_v45 }
 0xa44   :  { %v1140_v43 = vsub.f32 %v2829_v57, %v1138_v63 }
 0xa46   :  { %v1142_v0 = vmul.f32 %v1140_v43, %v1140_v43 }
 0xa48   :  { %v1146_v1 = vsel %vm171_vm2, %v1142_v0, 0.0 }
 0xa49   :  { %1147 = vadd.xlane.f32.xlu2 %v1146_v1 }
 0xa59   :  { %v1390_v58 = vpop.permute.xlu1 %1389 }
 0xab4   :  { %v1145_v4 = vpop.xlane.xlu0 %1144 }
 0xab5   :  { %v1149_v6 = vmul.f32 %v1145_v4, %v2567_v45 }
 0xab7   :  { %v1151_v7 = vadd.f32 1e-06, %v1149_v6 }
 0xab9   :  { %2359 = vrsqrt.f32 %v1151_v7  ;;  %vm1159_vm0 = vweird.f32 %v1151_v7 }
 0xabc   :  { %v1148_v8 = vpop.xlane.xlu2 %1147 }
 0xabd   :  { %v1150_v9 = vmul.f32 %v1148_v8, %v2567_v45 }
 0xabf   :  { %v2360_v11 = vpop.eup %2359  ;;  %v1152_v12 = vadd.f32 1e-06, %v1150_v9 }
 0xac0   :  { %v1154_v13 = vmul.f32 %v2360_v11, %v1151_v7  ;;  %vm1160_vm15 = vweird.f32 %v2360_v11 }
 0xac1   :  { %2361 = vrsqrt.f32 %v1152_v12  ;;  %vm1161_vm3 = vmor %vm1159_vm0, %vm1160_vm15  ;;  %vm1169_vm5 = vweird.f32 %v1152_v12 }
 0xac2   :  { %v1155_v14 = vmul.f32 %v2360_v11, %v1154_v13 }
 0xac4   :  { %v1156_v15 = vmul.f32 0.5, %v1155_v14 }
 0xac6   :  { %v1157_v17 = vsub.f32 1.5, %v1156_v15 }
 0xac7   :  { %v2362_v20 = vpop.eup %2361 }
 0xac8   :  { %v1158_v21 = vmul.f32 %v2360_v11, %v1157_v17  ;;  %v1164_v22 = vmul.f32 %v2362_v20, %v1152_v12  ;;  %vm1170_vm4 = vweird.f32 %v2362_v20 }
 0xac9   :  { %vm1171_vm6 = vmor %vm1169_vm5, %vm1170_vm4 }
 0xaca   :  { %v1162_v25 = vsel %vm1161_vm3, %v2360_v11, %v1158_v21  ;;  %v1165_v26 = vmul.f32 %v2362_v20, %v1164_v22 }
 0xacb   :  { %v1173_v24 = vmul.f32 %v1162_v25, %v1139_v23 }
 0xacc   :  { %v1166_v27 = vmul.f32 0.5, %v1165_v26 }
 0xacd   :  { %v1176_v29 = vmul.f32 %v1175_v19, %v1173_v24 }
 0xace   :  { %v1167_v31 = vsub.f32 1.5, %v1166_v27 }
 0xacf   :  { %v2856_v18 = vadd.f32 %v1178_v28, %v1176_v29 }
 0xad0   :  { %v1168_v32 = vmul.f32 %v2362_v20, %v1167_v31 }
 0xad1   :  { %2254 = vmatmul.msk.f32.vlgmr.msrb.gmra.mxu3 %vm171_vm2, %v2856_v18 }
 0xad2   :  { %v1172_v35 = vsel %vm1171_vm6, %v2362_v20, %v1168_v32 }
 0xad3   :  { %v1174_v36 = vmul.f32 %v1172_v35, %v1140_v43 }
 0xad5   :  { %v1177_v38 = vmul.f32 %v1175_v19, %v1174_v36 }
 0xad7   :  { %v2865_v37 = vadd.f32 %v1178_v28, %v1177_v38 }
 0xad9   :  { %2243 = vmatpush.xpose.msk.msra.mxu1 %vm171_vm2, %v2865_v37  ;;  %2255 = vmatmul.msk.f32.gmra.mxu3 %vm171_vm2, %v2865_v37 }
 0xadd   :  { %2244 = vmatpush.xpose.msk.msra.mxu1 %vm171_vm2, %v2856_v18 }
 0xae0   :  { %2245 = vmatmul.msk.f32.vlgmr.msra.gmra.mxu1 %vm171_vm2, %v2226_v44 }
 0xae1   :  { %2262 = vmatmul.msk.f32.vlgmr.msra.gmra.mxu3 %vm171_vm2, %v2856_v18  ;;  %2283 = vmatpush.xpose.msk.msrb.mxu1 %vm171_vm2, %v2241_v5 }
 0xae8   :  { %2246 = vmatmul.msk.f32.gmra.mxu1 %vm171_vm2, %v2227_v39  ;;  %v2235_v39 = vld [vmem:[%s3113_s5 + $0xc8] sm:$0xff] }
 0xae9   :  { %2263 = vmatmul.msk.f32.gmra.mxu3 %vm171_vm2, %v2865_v37 }
 0xaea   :  { %1548 = vmatpush.msrb.mxu3 %v2235_v39 }
 0xaf0   :  { %2247 = vmatmul.msk.f32.gmra.mxu1 %vm171_vm2, %v2228_v40 }
 0xaf8   :  { %2248 = vmatmul.msk.f32.gmra.mxu1 %vm171_vm2, %v2229_v41 }
 0xb00   :  { %2249 = vmatmul.msk.f32.gmra.mxu1 %vm171_vm2, %v2230_v30 }
 0xb08   :  { %2250 = vmatmul.msk.f32.gmra.mxu1 %vm171_vm2, %v2231_v34 }
 0xb10   :  { %2251 = vmatmul.msk.f32.gmra.mxu1 %vm171_vm2, %v2232_v42 }
 0xb18   :  { %2252 = vmatmul.msk.f32.gmra.mxu1 %vm171_vm2, %v2233_v46 }
 0xb20   :  { %2284 = vmatmul.msk.f32.vlgmr.msrb.gmra.mxu1 %vm171_vm2, %v2856_v18 }
 0xb28   :  { %2285 = vmatmul.msk.f32.gmra.mxu1 %vm171_vm2, %v2865_v37 }
 0xb54   :  { %v1273_v47 = vpop.f32.mrf.mxu3 }
 0xb55   :  { %v1274_v48 = vadd.f32 %v1273_v47, %v2859_v33 }
 0xb5c   :  { %v1276_v50 = vpop.f32.mrf.mxu3 }
 0xb5d   :  { %v1228_v49 = vpop.f32.mrf.mxu1  ;;  %v1277_v53 = vadd.f32 %v1276_v50, %v2859_v33 }
 0xb5e   :  { %1300 = vmatpush.msrb.mxu2 %v1228_v49 }
 0xb5f   :  { %2256 = vmatmul.msk.f32.vlgmr.msrb.gmra.mxu2 %vm108_vm1, %v1274_v48 }
 0xb64   :  { %v1412_v56 = vpop.f32.mrf.mxu3 }
 0xb65   :  { %v1231_v54 = vpop.f32.mrf.mxu1  ;;  %v1413_v59 = vadd.f32 %v1412_v56, %v1390_v58 }
 0xb66   :  { %1439 = vmatpush.msra.mxu2 %v1231_v54 }
 0xb67   :  { %2257 = vmatmul.msk.f32.gmra.mxu2 %vm108_vm1, %v1277_v53 }
 0xb6c   :  { %v1415_v23 = vpop.f32.mrf.mxu3 }
 0xb6d   :  { %v1234_v3 = vpop.f32.mrf.mxu1  ;;  %v1416_v60 = vadd.f32 %v1415_v23, %v1390_v58 }
 0xb6e   :  { %1635 = vmatpush.msra.mxu3 %v1234_v3  ;;  %v2240_v3 = vld [vmem:[%s3113_s5 + $0xf0] sm:$0xff] }
 0xb6f   :  { %2264 = vmatmul.msk.f32.vlgmr.msra.gmra.mxu2 %vm108_vm1, %v1413_v59 }
 0xb75   :  { %v2922_v61 = vpop.f32.mrf.mxu1 }
 0xb77   :  { %2265 = vmatmul.msk.f32.gmra.mxu2 %vm108_vm1, %v1416_v60 }
 0xb7d   :  { %v1240_v62 = vpop.f32.mrf.mxu1 }
 0xb7e   :  { %2258 = vmatpush.xpose.msk.msra.mxu0 %vm356_vm13, %v1240_v62 }
 0xb85   :  { %v1243_v63 = vpop.f32.mrf.mxu1 }
 0xb86   :  { %2266 = vmatpush.xpose.msk.msrb.mxu0 %vm356_vm13, %v1243_v63 }
 0xbe2   :  { %v1302_v43 = vpop.f32.mrf.mxu2 }
 0xbe3   :  { %v1303_v0 = vadd.f32 %v1302_v43, %v2637_v51 }
 0xbe5   :  { %v1308_v1 = vsel %vm356_vm13, %v1303_v0, -inf }
 0xbe6   :  { %1309 = vmax.xlane.f32.xlu0 %v1308_v1 }
 0xbea   :  { %v1305_v2 = vpop.f32.mrf.mxu2 }
 0xbeb   :  { %v1306_v4 = vadd.f32 %v1305_v2, %v2643_v55 }
 0xbed   :  { %v1311_v6 = vsel %vm356_vm13, %v1306_v4, -inf }
 0xbee   :  { %1312 = vmax.xlane.f32.xlu2 %v1311_v6 }
 0xbf2   :  { %v1441_v7 = vpop.f32.mrf.mxu2 }
 0xbf3   :  { %v1442_v8 = vadd.f32 %v1441_v7, %v2637_v51 }
 0xbf5   :  { %v1447_v9 = vsel %vm356_vm13, %v1442_v8, -inf }
 0xbf6   :  { %1448 = vmax.xlane.f32.xlu0 %v1447_v9 }
 0xbfa   :  { %v1444_v10 = vpop.f32.mrf.mxu2 }
 0xbfb   :  { %v1445_v11 = vadd.f32 %v1444_v10, %v2643_v55 }
 0xbfd   :  { %v1450_v12 = vsel %vm356_vm13, %v1445_v11, -inf }
 0xbfe   :  { %1451 = vmax.xlane.f32.xlu2 %v1450_v12 }
 0xc59   :  { %v1310_v13 = vpop.xlane.xlu0 %1309 }
 0xc5a   :  { %v1314_v14 = vsub.f32 %v1303_v0, %v1310_v13 }
 0xc5c   :  { %v1316_v15 = vmul.f32 1.442695, %v1314_v14 }
 0xc5e   :  { %2363 = vpow2.f32 %v1316_v15 }
 0xc61   :  { %v1313_v17 = vpop.xlane.xlu2 %1312 }
 0xc62   :  { %v1315_v20 = vsub.f32 %v1306_v4, %v1313_v17 }
 0xc64   :  { %v2364_v21 = vpop.eup %2363  ;;  %v1318_v22 = vmul.f32 1.442695, %v1315_v20 }
 0xc65   :  { %v1320_v19 = vsel %vm356_vm13, %v2364_v21, 0.0 }
 0xc66   :  { %2365 = vpow2.f32 %v1318_v22  ;;  %1321 = vadd.xlane.f32.xlu0 %v1320_v19 }
 0xc69   :  { %v1449_v25 = vpop.xlane.xlu0 %1448 }
 0xc6a   :  { %v1453_v26 = vsub.f32 %v1442_v8, %v1449_v25 }
 0xc6c   :  { %v2936_v24 = vpop.eup %2365  ;;  %v1455_v28 = vmul.f32 1.442695, %v1453_v26 }
 0xc6d   :  { %v1323_v27 = vsel %vm356_vm13, %v2936_v24, 0.0 }
 0xc6e   :  { %2367 = vpow2.f32 %v1455_v28  ;;  %1324 = vadd.xlane.f32.xlu2 %v1323_v27 }
 0xc71   :  { %v1452_v29 = vpop.xlane.xlu2 %1451 }
 0xc72   :  { %v1454_v31 = vsub.f32 %v1445_v11, %v1452_v29 }
 0xc74   :  { %v2940_v32 = vpop.eup %2367  ;;  %v1457_v35 = vmul.f32 1.442695, %v1454_v31 }
 0xc75   :  { %v1459_v36 = vsel %vm356_vm13, %v2940_v32, 0.0 }
 0xc76   :  { %2369 = vpow2.f32 %v1457_v35  ;;  %1460 = vadd.xlane.f32.xlu1 %v1459_v36  ;;  %v1246_v35 = vpop.f32.mrf.mxu1 }
 0xc7c   :  { %v2944_v38 = vpop.eup %2369 }
 0xc7d   :  { %v1462_v44 = vsel %vm356_vm13, %v2944_v38, 0.0 }
 0xc7e   :  { %1463 = vadd.xlane.f32.xlu0 %v1462_v44  ;;  %v1249_v44 = vpop.f32.mrf.mxu1 }
 0xc86   :  { %1585 = vrot.lane.b32.xlu2 %v2859_v33, %s2410_s28 }
 0xc92   :  { %1754 = vrot.lane.b32.xlu0 %v2859_v33, %s2411_s29 }
 0xcd9   :  { %v1322_v40 = vpop.xlane.xlu0 %1321 }
 0xcda   :  { %2371 = vrcp.f32 %v1322_v40  ;;  %v1337_v42 = vand.u32 2147483648, %v1322_v40  ;;  %v1335_v47 = vand.u32 2147483647, %v1322_v40  ;;  %vm1331_vm8 = vweird.f32 %v1322_v40 }
 0xcdc   :  { %v1338_v49 = vor.u32 1.1754944e-38, %v1337_v42  ;;  %vm1336_vm10 = vcmp.eq.f32.partialorder %v1335_v47, 8.507059e+37 }
 0xce0   :  { %v2372_v41 = vpop.eup %2371 }
 0xce1   :  { %v1327_v5 = vmul.f32 %v2372_v41, %v1322_v40  ;;  %v1325_v30 = vpop.xlane.xlu2 %1324  ;;  %vm1332_vm7 = vweird.f32 %v2372_v41 }
 0xce2   :  { %2373 = vrcp.f32 %v1325_v30  ;;  %vm1333_vm9 = vmor %vm1331_vm8, %vm1332_vm7  ;;  %v1352_v23 = vand.u32 2147483648, %v1325_v30  ;;  %v1350_v62 = vand.u32 2147483647, %v1325_v30  ;;  %vm1346_vm12 = vweird.f32 %v1325_v30 }
 0xce3   :  { %v1328_v34 = vsub.f32 1.0, %v1327_v5 }
 0xce4   :  { %v1353_v0 = vor.u32 1.1754944e-38, %v1352_v23  ;;  %vm1351_vm15 = vcmp.eq.f32.partialorder %v1350_v62, 8.507059e+37 }
 0xce5   :  { %v1329_v46 = vmul.f32 %v2372_v41, %v1328_v34  ;;  %v1777_v34 = vpop.f32.mrf.mxu1 }
 0xce7   :  { %v1330_v48 = vadd.f32 %v2372_v41, %v1329_v46 }
 0xce8   :  { %v2374_v33 = vpop.eup %2373 }
 0xce9   :  { %v1334_v50 = vsel %vm1333_vm9, %v2372_v41, %v1330_v48  ;;  %v1342_v53 = vmul.f32 %v2374_v33, %v1325_v30  ;;  %v1461_v54 = vpop.xlane.xlu1 %1460  ;;  %vm1347_vm11 = vweird.f32 %v2374_v33  ;;  %v1586_v39 = vpop.permute.xlu2 %1585 }
 0xcea   :  { %v1339_v56 = vsel %vm1336_vm10, %v1338_v49, %v1334_v50  ;;  %2375 = vrcp.f32 %v1461_v54  ;;  %vm1348_vm14 = vmor %vm1346_vm12, %vm1347_vm11  ;;  %v1476_v9 = vand.u32 2147483648, %v1461_v54  ;;  %v1474_v11 = vand.u32 2147483647, %v1461_v54 }
 0xceb   :  { %v1343_v58 = vsub.f32 1.0, %v1342_v53  ;;  %v1340_v59 = vmul.f32 %v2364_v21, %v1339_v56  ;;  %vm1470_vm3 = vweird.f32 %v1461_v54 }
 0xcec   :  { %v1477_v14 = vor.u32 1.1754944e-38, %v1476_v9  ;;  %vm1475_vm5 = vcmp.eq.f32.partialorder %v1474_v11, 8.507059e+37 }
 0xced   :  { %v1344_v60 = vmul.f32 %v2374_v33, %v1343_v58  ;;  %2259 = vmatmul.msk.f32.vlgmr.msra.gmra.mxu0 %vm356_vm13, %v1340_v59  ;;  %v1780_v47 = vpop.f32.mrf.mxu1 }
 0xcee   :  { %2273 = vmatpush.xpose.msk.msra.mxu0 %vm171_vm2, %v2240_v3 }
 0xcef   :  { %v1345_v63 = vadd.f32 %v2374_v33, %v1344_v60 }
 0xcf0   :  { %v2376_v43 = vpop.eup %2375 }
 0xcf1   :  { %v1466_v1 = vmul.f32 %v2376_v43, %v1461_v54  ;;  %v1464_v2 = vpop.xlane.xlu0 %1463  ;;  %v1349_v4 = vsel %vm1348_vm14, %v2374_v33, %v1345_v63  ;;  %vm1471_vm0 = vweird.f32 %v2376_v43 }
 0xcf2   :  { %2377 = vrcp.f32 %v1464_v2  ;;  %v1354_v6 = vsel %vm1351_vm15, %v1353_v0, %v1349_v4  ;;  %vm1472_vm4 = vmor %vm1470_vm3, %vm1471_vm0  ;;  %v1491_v19 = vand.u32 2147483648, %v1464_v2  ;;  %v1489_v26 = vand.u32 2147483647, %v1464_v2 }
 0xcf3   :  { %v1467_v7 = vsub.f32 1.0, %v1466_v1  ;;  %v1355_v8 = vmul.f32 %v2936_v24, %v1354_v6  ;;  %vm1485_vm7 = vweird.f32 %v1464_v2 }
 0xcf4   :  { %v1492_v28 = vor.u32 1.1754944e-38, %v1491_v19  ;;  %vm1490_vm9 = vcmp.eq.f32.partialorder %v1489_v26, 8.507059e+37 }
 0xcf5   :  { %v1468_v10 = vmul.f32 %v2376_v43, %v1467_v7  ;;  %2260 = vmatmul.msk.f32.gmra.mxu0 %vm356_vm13, %v1355_v8 }
 0xcf7   :  { %v1469_v12 = vadd.f32 %v2376_v43, %v1468_v10 }
 0xcf8   :  { %v2378_v13 = vpop.eup %2377 }
 0xcf9   :  { %v1473_v15 = vsel %vm1472_vm4, %v2376_v43, %v1469_v12  ;;  %v1481_v17 = vmul.f32 %v2378_v13, %v1464_v2  ;;  %vm1486_vm6 = vweird.f32 %v2378_v13 }
 0xcfa   :  { %v1478_v20 = vsel %vm1475_vm5, %v1477_v14, %v1473_v15  ;;  %vm1487_vm8 = vmor %vm1485_vm7, %vm1486_vm6 }
 0xcfb   :  { %v1482_v21 = vsub.f32 1.0, %v1481_v17  ;;  %v1479_v22 = vmul.f32 %v2940_v32, %v1478_v20  ;;  %v2234_v32 = vld [vmem:[%s3113_s5 + $0xc0] sm:$0xff] }
 0xcfc   :  { %1577 = vmatpush.msrb.mxu2 %v2234_v32 }
 0xcfd   :  { %v1483_v25 = vmul.f32 %v2378_v13, %v1482_v21  ;;  %2267 = vmatmul.msk.f32.vlgmr.msrb.gmra.mxu0 %vm356_vm13, %v1479_v22 }
 0xcfe   :  { %2278 = vmatpush.xpose.msk.msra.mxu2 %vm356_vm13, %v1246_v35 }
 0xcff   :  { %v1484_v24 = vadd.f32 %v2378_v13, %v1483_v25 }
 0xd01   :  { %v1488_v27 = vsel %vm1487_vm8, %v2378_v13, %v1484_v24 }
 0xd02   :  { %v1493_v29 = vsel %vm1490_vm9, %v1492_v28, %v1488_v27 }
 0xd03   :  { %v1494_v31 = vmul.f32 %v2944_v38, %v1493_v29 }
 0xd04   :  { %v1755_v42 = vpop.permute.xlu0 %1754 }
 0xd05   :  { %2268 = vmatmul.msk.f32.gmra.mxu0 %vm356_vm13, %v1494_v31  ;;  %v1778_v46 = vadd.f32 %v1777_v34, %v1755_v42  ;;  %v1781_v48 = vadd.f32 %v1780_v47, %v1755_v42 }
 0xd0d   :  { %2274 = vmatmul.msk.f32.vlgmr.msra.gmra.mxu0 %vm171_vm2, %v2856_v18 }
 0xd15   :  { %2275 = vmatmul.msk.f32.gmra.mxu0 %vm171_vm2, %v2865_v37 }
 0xd6a   :  { %v1382_v36 = vpop.f32.mrf.mxu0 }
 0xd6b   :  { %2271 = vmatmul.msk.f32.vlgmr.msrb.gmra.mxu2 %vm108_vm1, %v1382_v36 }
 0xd6c   :  { %2288 = vmatpush.xpose.msk.msrb.mxu2 %vm356_vm13, %v1249_v44 }
 0xd72   :  { %v1385_v38 = vpop.f32.mrf.mxu0 }
 0xd73   :  { %2272 = vmatmul.msk.f32.gmra.mxu2 %vm108_vm1, %v1385_v38 }
 0xd7a   :  { %v1521_v18 = vpop.f32.mrf.mxu0 }
 0xd7b   :  { %2269 = vmatmul.msk.f32.vlgmr.msrb.gmra.mxu3 %vm108_vm1, %v1521_v18 }
 0xd7c   :  { %1804 = vmatpush.msrb.mxu3 %v2922_v61 }
 0xd82   :  { %v1524_v37 = vpop.f32.mrf.mxu0 }
 0xd83   :  { %2270 = vmatmul.msk.f32.gmra.mxu3 %vm108_vm1, %v1524_v37 }
 0xd8a   :  { %v1608_v40 = vpop.f32.mrf.mxu0 }
 0xd8b   :  { %v1609_v41 = vadd.f32 %v1608_v40, %v1586_v39 }
 0xd8d   :  { %2276 = vmatmul.msk.f32.vlgmr.msra.gmra.mxu3 %vm108_vm1, %v1609_v41 }
 0xd92   :  { %v1611_v5 = vpop.f32.mrf.mxu0 }
 0xd93   :  { %v1612_v30 = vadd.f32 %v1611_v5, %v1586_v39 }
 0xd95   :  { %2277 = vmatmul.msk.f32.gmra.mxu3 %vm108_vm1, %v1612_v30 }
 0xd9d   :  { %2286 = vmatmul.msk.f32.vlgmr.msrb.gmra.mxu3 %vm108_vm1, %v1778_v46 }
 0xda5   :  { %2287 = vmatmul.msk.f32.gmra.mxu3 %vm108_vm1, %v1781_v48 }
 0xdee   :  { %v1579_v61 = vpop.f32.mrf.mxu2 }
 0xdfe   :  { %v1550_v33 = vpop.f32.mrf.mxu3 }
 0xdff   :  { %v2984_v49 = vadd.f32 %v1579_v61, %v1550_v33 }
 0xe06   :  { %v2986_v50 = vpop.f32.mrf.mxu3 }
 0xe10   :  { %v1637_v53 = vpop.f32.mrf.mxu3 }
 0xe11   :  { %v1638_v54 = vadd.f32 %v1637_v53, %v2637_v51 }
 0xe13   :  { %v1643_v56 = vsel %vm356_vm13, %v1638_v54, -inf }
 0xe14   :  { %1644 = vmax.xlane.f32.xlu2 %v1643_v56 }
 0xe18   :  { %v1640_v58 = vpop.f32.mrf.mxu3 }
 0xe19   :  { %v1641_v59 = vadd.f32 %v1640_v58, %v2643_v55 }
 0xe1b   :  { %v1646_v3 = vsel %vm356_vm13, %v1641_v59, -inf }
 0xe1c   :  { %1647 = vmax.xlane.f32.xlu0 %v1646_v3 }
 0xe20   :  { %v1806_v23 = vpop.f32.mrf.mxu3 }
 0xe21   :  { %v1807_v60 = vadd.f32 %v1806_v23, %v2637_v51 }
 0xe23   :  { %v1812_v62 = vsel %vm356_vm13, %v1807_v60, -inf }
 0xe24   :  { %1813 = vmax.xlane.f32.xlu1 %v1812_v62 }
 0xe28   :  { %v1809_v63 = vpop.f32.mrf.mxu3 }
 0xe29   :  { %v1810_v43 = vadd.f32 %v1809_v63, %v2643_v55 }
 0xe2b   :  { %v1815_v0 = vsel %vm356_vm13, %v1810_v43, -inf }
 0xe2c   :  { %1816 = vmax.xlane.f32.xlu1 %v1815_v0 }
 0xe87   :  { %v1645_v1 = vpop.xlane.xlu2 %1644 }
 0xe88   :  { %v1649_v2 = vsub.f32 %v1638_v54, %v1645_v1 }
 0xe8a   :  { %v1651_v4 = vmul.f32 1.442695, %v1649_v2 }
 0xe8c   :  { %2379 = vpow2.f32 %v1651_v4 }
 0xe8f   :  { %v1648_v6 = vpop.xlane.xlu0 %1647 }
 0xe90   :  { %v1650_v7 = vsub.f32 %v1641_v59, %v1648_v6 }
 0xe92   :  { %v2380_v8 = vpop.eup %2379  ;;  %v1653_v9 = vmul.f32 1.442695, %v1650_v7 }
 0xe93   :  { %v1655_v10 = vsel %vm356_vm13, %v2380_v8, 0.0 }
 0xe94   :  { %2381 = vpow2.f32 %v1653_v9  ;;  %1656 = vadd.xlane.f32.xlu1 %v1655_v10 }
 0xe97   :  { %v1814_v51 = vpop.xlane.xlu1 %1813 }
 0xe98   :  { %v1818_v11 = vsub.f32 %v1807_v60, %v1814_v51 }
 0xe9a   :  { %v2382_v12 = vpop.eup %2381  ;;  %v1820_v13 = vmul.f32 1.442695, %v1818_v11 }
 0xe9b   :  { %v1658_v55 = vsel %vm356_vm13, %v2382_v12, 0.0 }
 0xe9c   :  { %2383 = vpow2.f32 %v1820_v13  ;;  %1659 = vadd.xlane.f32.xlu1 %v1658_v55  ;;  %v2237_v13 = vld [vmem:[%s3113_s5 + $0xd8] sm:$0xff]  ;;  %v1582_v55 = vpop.f32.mrf.mxu2 }
 0xe9f   :  { %v1817_v14 = vpop.xlane.xlu1 %1816 }
 0xea0   :  { %v1819_v15 = vsub.f32 %v1810_v43, %v1817_v14 }
 0xea2   :  { %v2998_v17 = vpop.eup %2383  ;;  %v1822_v20 = vmul.f32 1.442695, %v1819_v15 }
 0xea3   :  { %v1824_v21 = vsel %vm356_vm13, %v2998_v17, 0.0 }
 0xea4   :  { %2385 = vpow2.f32 %v1822_v20  ;;  %1825 = vadd.xlane.f32.xlu2 %v1824_v21 }
 0xeaa   :  { %v3002_v22 = vpop.eup %2385 }
 0xeab   :  { %v1827_v19 = vsel %vm356_vm13, %v3002_v22, 0.0 }
 0xeac   :  { %1828 = vadd.xlane.f32.xlu0 %v1827_v19 }
 0xf07   :  { %v1657_v25 = vpop.xlane.xlu1 %1656 }
 0xf08   :  { %2387 = vrcp.f32 %v1657_v25  ;;  %v1672_v29 = vand.u32 2147483648, %v1657_v25  ;;  %v1670_v32 = vand.u32 2147483647, %v1657_v25  ;;  %vm1666_vm11 = vweird.f32 %v1657_v25 }
 0xf0a   :  { %v1673_v44 = vor.u32 1.1754944e-38, %v1672_v29  ;;  %vm1671_vm14 = vcmp.eq.f32.partialorder %v1670_v32, 8.507059e+37 }
 0xf0e   :  { %v2388_v26 = vpop.eup %2387 }
 0xf0f   :  { %v1662_v24 = vmul.f32 %v2388_v26, %v1657_v25  ;;  %v1660_v28 = vpop.xlane.xlu1 %1659  ;;  %vm1667_vm10 = vweird.f32 %v2388_v26 }
 0xf10   :  { %2389 = vrcp.f32 %v1660_v28  ;;  %vm1668_vm12 = vmor %vm1666_vm11, %vm1667_vm10  ;;  %v1687_v5 = vand.u32 2147483648, %v1660_v28  ;;  %v1685_v34 = vand.u32 2147483647, %v1660_v28  ;;  %vm1681_vm0 = vweird.f32 %v1660_v28 }
 0xf11   :  { %v1663_v27 = vsub.f32 1.0, %v1662_v24  ;;  %v1925_v24 = vperm.slane %v2852_v16, 3 }
 0xf12   :  { %v1688_v47 = vor.u32 1.1754944e-38, %v1687_v5  ;;  %vm1686_vm4 = vcmp.eq.f32.partialorder %v1685_v34, 8.507059e+37  ;;  %v2296_v34 = vld [vmem:[%s3115_s6 + $0x60] sm:$0xff] }
 0xf13   :  { %v1664_v31 = vmul.f32 %v2388_v26, %v1663_v27  ;;  %v1583_v27 = vadd.f32 %v1582_v55, %v2986_v50  ;;  %2007 = vmatpush.msra.mxu1 %v2296_v34 }
 0xf15   :  { %v1665_v35 = vadd.f32 %v2388_v26, %v1664_v31 }
 0xf16   :  { %v2390_v36 = vpop.eup %2389 }
 0xf17   :  { %v1669_v38 = vsel %vm1668_vm12, %v2388_v26, %v1665_v35  ;;  %v1677_v18 = vmul.f32 %v2390_v36, %v1660_v28  ;;  %v1826_v37 = vpop.xlane.xlu2 %1825  ;;  %vm1682_vm15 = vweird.f32 %v2390_v36 }
 0xf18   :  { %v1674_v39 = vsel %vm1671_vm14, %v1673_v44, %v1669_v38  ;;  %2391 = vrcp.f32 %v1826_v37  ;;  %vm1683_vm3 = vmor %vm1681_vm0, %vm1682_vm15  ;;  %v1841_v58 = vand.u32 2147483648, %v1826_v37  ;;  %v1839_v3 = vand.u32 2147483647, %v1826_v37 }
 0xf19   :  { %v1678_v40 = vsub.f32 1.0, %v1677_v18  ;;  %v1675_v41 = vmul.f32 %v2380_v8, %v1674_v39  ;;  %vm1835_vm6 = vweird.f32 %v1826_v37 }
 0xf1a   :  { %v1842_v62 = vor.u32 1.1754944e-38, %v1841_v58  ;;  %vm1840_vm8 = vcmp.eq.f32.partialorder %v1839_v3, 8.507059e+37 }
 0xf1b   :  { %v1679_v30 = vmul.f32 %v2390_v36, %v1678_v40  ;;  %2279 = vmatmul.msk.f32.vlgmr.msra.gmra.mxu2 %vm356_vm13, %v1675_v41 }
 0xf1d   :  { %v1680_v42 = vadd.f32 %v2390_v36, %v1679_v30 }
 0xf1e   :  { %v2392_v46 = vpop.eup %2391 }
 0xf1f   :  { %v1831_v48 = vmul.f32 %v2392_v46, %v1826_v37  ;;  %v1829_v61 = vpop.xlane.xlu0 %1828  ;;  %v1684_v33 = vsel %vm1683_vm3, %v2390_v36, %v1680_v42  ;;  %vm1836_vm5 = vweird.f32 %v2392_v46  ;;  %v2295_v42 = vld [vmem:[%s3115_s6 + $0x58] sm:$0xff] }
 0xf20   :  { %2393 = vrcp.f32 %v1829_v61  ;;  %v1689_v53 = vsel %vm1686_vm4, %v1688_v47, %v1684_v33  ;;  %vm1837_vm7 = vmor %vm1835_vm6, %vm1836_vm5  ;;  %v1856_v4 = vand.u32 2147483648, %v1829_v61  ;;  %v1854_v7 = vand.u32 2147483647, %v1829_v61  ;;  %2008 = vmatpush.msra.mxu1 %v2295_v42  ;;  %v2293_v47 = vld [vmem:[%s3115_s6 + $0x48] sm:$0xff] }
 0xf21   :  { %v1832_v54 = vsub.f32 1.0, %v1831_v48  ;;  %v1690_v56 = vmul.f32 %v2382_v12, %v1689_v53  ;;  %vm1850_vm10 = vweird.f32 %v1829_v61  ;;  %v2236_v12 = vld [vmem:[%s3113_s5 + $0xd0] sm:$0xff]  ;;  %vm2093_vm5 = vcmask 254976  }
 0xf22   :  { %v1857_v9 = vor.u32 1.1754944e-38, %v1856_v4  ;;  %vm1855_vm12 = vcmp.eq.f32.partialorder %v1854_v7, 8.507059e+37  ;;  %1744 = vmatpush.msrb.mxu0 %v2236_v12 }
 0xf23   :  { %v1833_v59 = vmul.f32 %v2392_v46, %v1832_v54  ;;  %2280 = vmatmul.msk.f32.gmra.mxu2 %vm356_vm13, %v1690_v56 }
 0xf24   :  { %1913 = vmatpush.msra.mxu0 %v2237_v13 }
 0xf25   :  { %v1834_v23 = vadd.f32 %v2392_v46, %v1833_v59 }
 0xf26   :  { %v2394_v60 = vpop.eup %2393 }
 0xf27   :  { %v1838_v63 = vsel %vm1837_vm7, %v2392_v46, %v1834_v23  ;;  %v1846_v43 = vmul.f32 %v2394_v60, %v1829_v61  ;;  %vm1851_vm9 = vweird.f32 %v2394_v60  ;;  %v2294_v46 = vld [vmem:[%s3115_s6 + $0x50] sm:$0xff] }
 0xf28   :  { %v1843_v0 = vsel %vm1840_vm8, %v1842_v62, %v1838_v63  ;;  %vm1852_vm11 = vmor %vm1850_vm10, %vm1851_vm9  ;;  %2009 = vmatpush.msra.mxu1 %v2294_v46  ;;  %v2061_v46 = vperm.slane %v2852_v16, 6 }
 0xf29   :  { %v1847_v1 = vsub.f32 1.0, %v1846_v43  ;;  %v1844_v2 = vmul.f32 %v2998_v17, %v1843_v0  ;;  %v1982_v0 = vperm.slane %v2852_v16, 4 }
 0xf2a   :  { %2010 = vmatpush.msra.mxu1 %v2293_v47 }
 0xf2b   :  { %v1848_v6 = vmul.f32 %v2394_v60, %v1847_v1  ;;  %2289 = vmatmul.msk.f32.vlgmr.msrb.gmra.mxu2 %vm356_vm13, %v1844_v2 }
 0xf2d   :  { %v1849_v8 = vadd.f32 %v2394_v60, %v1848_v6  ;;  %v1985_v6 = vperm.slane %v2852_v16, 5 }
 0xf2f   :  { %v1853_v10 = vsel %vm1852_vm11, %v2394_v60, %v1849_v8 }
 0xf30   :  { %v1858_v51 = vsel %vm1855_vm12, %v1857_v9, %v1853_v10 }
 0xf31   :  { %v1859_v11 = vmul.f32 %v3002_v22, %v1858_v51 }
 0xf33   :  { %2290 = vmatmul.msk.f32.gmra.mxu2 %vm356_vm13, %v1859_v11 }
 0xf9e   :  { %v1717_v14 = vpop.f32.mrf.mxu2 }
 0xf9f   :  { %2281 = vmatmul.msk.f32.vlgmr.msrb.gmra.mxu0 %vm108_vm1, %v1717_v14  ;;  %v2300_v14 = vld [vmem:[%s3115_s6 + $0x80] sm:$0xff] }
 0xfa0   :  { %2048 = vmatpush.xpose.msra.mxu3 %v2300_v14 }
 0xfa6   :  { %v1720_v15 = vpop.f32.mrf.mxu2 }
 0xfa7   :  { %2282 = vmatmul.msk.f32.gmra.mxu0 %vm108_vm1, %v1720_v15  ;;  %v2299_v15 = vld [vmem:[%s3115_s6 + $0x78] sm:$0xff] }
 0xfa8   :  { %2049 = vmatpush.xpose.msra.mxu3 %v2299_v15 }
 0xfae   :  { %v1886_v17 = vpop.f32.mrf.mxu2 }
 0xfaf   :  { %2291 = vmatmul.msk.f32.vlgmr.msra.gmra.mxu0 %vm108_vm1, %v1886_v17  ;;  %v2298_v17 = vld [vmem:[%s3115_s6 + $0x70] sm:$0xff] }
 0xfb0   :  { %2050 = vmatpush.xpose.msra.mxu3 %v2298_v17 }
 0xfb6   :  { %v1889_v20 = vpop.f32.mrf.mxu2 }
 0xfb7   :  { %2292 = vmatmul.msk.f32.gmra.mxu0 %vm108_vm1, %v1889_v20  ;;  %v2297_v20 = vld [vmem:[%s3115_s6 + $0x68] sm:$0xff] }
 0xfb8   :  { %2051 = vmatpush.xpose.msra.mxu3 %v2297_v20 }
0x101c   :  { %v1746_v21 = vpop.f32.mrf.mxu0 }
0x101d   :  { %v1752_v19 = vadd.f32 %v1746_v21, %v2984_v49  ;;  %v2312_v21 = vld [vmem:[%s3115_s6 + $0x88] ss:$0 sm:$0xff] }
0x1024   :  { %v1749_v22 = vpop.f32.mrf.mxu0 }
0x1025   :  { %v1753_v31 = vadd.f32 %v1749_v22, %v1583_v27 }
0x102c   :  { %v1915_v25 = vpop.f32.mrf.mxu0 }
0x102d   :  { %v1921_v26 = vadd.f32 %v1915_v25, %v1752_v19 }
0x102f   :  { %v1923_v28 = vadd.f32 %v1921_v26, %v2824_v52 }
0x1031   :  { %v3026_v29 = vadd.f32 %v1925_v24, %v1923_v28 }
0x1033   :  { %v1938_v32 = vsel %vm171_vm2, %v3026_v29, 0.0 }
0x1034   :  { %1939 = vadd.xlane.f32.xlu1 %v1938_v32  ;;  %v1918_v35 = vpop.f32.mrf.mxu0 }
0x1035   :  { %v1922_v36 = vadd.f32 %v1918_v35, %v1753_v31 }
0x1037   :  { %v1924_v44 = vadd.f32 %v1922_v36, %v2829_v57 }
0x1039   :  { %v3031_v49 = vadd.f32 %v1925_v24, %v1924_v44 }
0x103b   :  { %v1941_v38 = vsel %vm171_vm2, %v3031_v49, 0.0 }
0x103c   :  { %1942 = vadd.xlane.f32.xlu2 %v1941_v38 }
0x10a7   :  { %v1940_v52 = vpop.xlane.xlu1 %1939 }
0x10a8   :  { %v1944_v50 = vmul.f32 %v1940_v52, %v2567_v45 }
0x10aa   :  { %v1946_v18 = vsub.f32 %v3026_v29, %v1944_v50 }
0x10ac   :  { %v1948_v37 = vmul.f32 %v1946_v18, %v1946_v18 }
0x10ae   :  { %v1950_v39 = vsel %vm171_vm2, %v1948_v37, 0.0 }
0x10af   :  { %1951 = vadd.xlane.f32.xlu0 %v1950_v39  ;;  %v1943_v40 = vpop.xlane.xlu2 %1942 }
0x10b0   :  { %v1945_v41 = vmul.f32 %v1943_v40, %v2567_v45 }
0x10b2   :  { %v1947_v57 = vsub.f32 %v3031_v49, %v1945_v41 }
0x10b4   :  { %v1949_v5 = vmul.f32 %v1947_v57, %v1947_v57 }
0x10b6   :  { %v1953_v30 = vsel %vm171_vm2, %v1949_v5, 0.0 }
0x10b7   :  { %1954 = vadd.xlane.f32.xlu1 %v1953_v30 }
0x1122   :  { %v1952_v48 = vpop.xlane.xlu0 %1951 }
0x1123   :  { %v1956_v61 = vmul.f32 %v1952_v48, %v2567_v45 }
0x1125   :  { %v1958_v33 = vadd.f32 1e-06, %v1956_v61 }
0x1127   :  { %2395 = vrsqrt.f32 %v1958_v33  ;;  %vm1966_vm14 = vweird.f32 %v1958_v33 }
0x112a   :  { %v1955_v53 = vpop.xlane.xlu1 %1954 }
0x112b   :  { %v1957_v54 = vmul.f32 %v1955_v53, %v2567_v45 }
0x112d   :  { %v2396_v56 = vpop.eup %2395  ;;  %v1959_v58 = vadd.f32 1e-06, %v1957_v54 }
0x112e   :  { %v1961_v59 = vmul.f32 %v2396_v56, %v1958_v33  ;;  %vm1967_vm1 = vweird.f32 %v2396_v56  ;;  %v2069_v33 = vld [vmem:[%s3116_s4] sm:$0x3] }
0x112f   :  { %2397 = vrsqrt.f32 %v1959_v58  ;;  %vm1968_vm15 = vmor %vm1966_vm14, %vm1967_vm1  ;;  %vm1976_vm3 = vweird.f32 %v1959_v58 }
0x1130   :  { %v1962_v3 = vmul.f32 %v2396_v56, %v1961_v59  ;;  %v2067_v59 = vld [vmem:[%s3117_s8 + $0x18] sm:$0xff] }
0x1131   :  { %2137 = vmatpush.msrb.mxu0 %v2067_v59 }
0x1132   :  { %v1963_v23 = vmul.f32 0.5, %v1962_v3  ;;  %v2066_v3 = vld [vmem:[%s3117_s8 + $0x10] sm:$0xff] }
0x1133   :  { %2138 = vmatpush.msrb.mxu0 %v2066_v3 }
0x1134   :  { %v1964_v60 = vsub.f32 1.5, %v1963_v23  ;;  %v2065_v23 = vld [vmem:[%s3117_s8 + $0x8] sm:$0xff] }
0x1135   :  { %v2398_v62 = vpop.eup %2397  ;;  %2139 = vmatpush.msrb.mxu0 %v2065_v23 }
0x1136   :  { %v1965_v63 = vmul.f32 %v2396_v56, %v1964_v60  ;;  %v1971_v43 = vmul.f32 %v2398_v62, %v1959_v58  ;;  %vm1977_vm0 = vweird.f32 %v2398_v62  ;;  %v2064_v60 = vld [vmem:[%s3117_s8] sm:$0xff] }
0x1137   :  { %vm1978_vm4 = vmor %vm1976_vm3, %vm1977_vm0  ;;  %2140 = vmatpush.msrb.mxu0 %v2064_v60 }
0x1138   :  { %v1969_v1 = vsel %vm1968_vm15, %v2396_v56, %v1965_v63  ;;  %v1972_v2 = vmul.f32 %v2398_v62, %v1971_v43 }
0x1139   :  { %v1980_v4 = vmul.f32 %v1969_v1, %v1946_v18 }
0x113a   :  { %v1973_v7 = vmul.f32 0.5, %v1972_v2 }
0x113b   :  { %v1983_v8 = vmul.f32 %v1982_v0, %v1980_v4 }
0x113c   :  { %v1974_v9 = vsub.f32 1.5, %v1973_v7  ;;  %v2068_v7 = vld [vmem:[%s3117_s8 + $0x20] sm:$0xff] }
0x113d   :  { %v1986_v10 = vadd.f32 %v1985_v6, %v1983_v8 }
0x113e   :  { %v1975_v51 = vmul.f32 %v2398_v62, %v1974_v9  ;;  %v2116_v9 = vperm.slane %v2068_v7, 0 }
0x113f   :  { %2302 = vmatmul.msk.f32.vlgmr.msra.gmra.mxu1 %vm171_vm2, %v1986_v10 }
0x1140   :  { %v1979_v11 = vsel %vm1978_vm4, %v2398_v62, %v1975_v51 }
0x1141   :  { %v1981_v12 = vmul.f32 %v1979_v11, %v1947_v57  ;;  %v2118_v11 = vperm.slane %v2068_v7, 1 }
0x1143   :  { %v1984_v13 = vmul.f32 %v1982_v0, %v1981_v12 }
0x1145   :  { %v1987_v55 = vadd.f32 %v1985_v6, %v1984_v13  ;;  %v2121_v13 = vperm.slane %v2068_v7, 2 }
0x1147   :  { %2303 = vmatmul.msk.f32.gmra.mxu1 %vm171_vm2, %v1987_v55 }
0x11bc   :  { %v2012_v22 = vpop.f32.mrf.mxu1 }
0x11bd   :  { %v2013_v19 = vadd.f32 %v2312_v21, %v2012_v22 }
0x11bf   :  { %v2018_v25 = vmul.f32 %v2013_v19, %v2013_v19 }
0x11c1   :  { %v2020_v26 = vmul.f32 %v2018_v25, %v2013_v19 }
0x11c3   :  { %v2022_v24 = vmul.f32 0.044715, %v2020_v26 }
0x11c4   :  { %v2015_v28 = vpop.f32.mrf.mxu1 }
0x11c5   :  { %v2024_v27 = vadd.f32 %v2022_v24, %v2013_v19  ;;  %v2016_v31 = vadd.f32 %v2312_v21, %v2015_v28 }
0x11c7   :  { %v2026_v32 = vmul.f32 0.7978846, %v2024_v27  ;;  %v2019_v35 = vmul.f32 %v2016_v31, %v2016_v31 }
0x11c9   :  { %2399 = vtanh.f32 %v2026_v32  ;;  %v2021_v36 = vmul.f32 %v2019_v35, %v2016_v31 }
0x11cb   :  { %v2023_v44 = vmul.f32 0.044715, %v2021_v36 }
0x11cd   :  { %v2025_v38 = vadd.f32 %v2023_v44, %v2016_v31 }
0x11cf   :  { %v2400_v52 = vpop.eup %2399  ;;  %v2027_v50 = vmul.f32 0.7978846, %v2025_v38 }
0x11d0   :  { %v2030_v18 = vadd.f32 1.0, %v2400_v52 }
0x11d1   :  { %2401 = vtanh.f32 %v2027_v50 }
0x11d2   :  { %v2032_v37 = vmul.f32 0.5, %v2030_v18 }
0x11d4   :  { %v2034_v39 = vmul.f32 %v2032_v37, %v2013_v19 }
0x11d6   :  { %2052 = vmatmul.f32.vlgmr.msra.gmra.mxu3 %v2034_v39 }
0x11d7   :  { %v2402_v40 = vpop.eup %2401 }
0x11d8   :  { %v2031_v41 = vadd.f32 1.0, %v2402_v40 }
0x11da   :  { %v2033_v57 = vmul.f32 0.5, %v2031_v41 }
0x11dc   :  { %v2035_v5 = vmul.f32 %v2033_v57, %v2016_v31 }
0x11de   :  { %2055 = vmatmul.f32.gmra.mxu3 %v2035_v5 }
0x1259   :  { %v2053_v30 = vpop.f32.mrf.mxu3 }
0x125a   :  { %v2059_v42 = vadd.f32 %v2053_v30, %v3026_v29 }
0x125c   :  { %v2062_v61 = vadd.f32 %v2061_v46, %v2059_v42 }
0x1261   :  { %v2056_v34 = vpop.f32.mrf.mxu3 }
0x1262   :  { %v2060_v47 = vadd.f32 %v2056_v34, %v3031_v49 }
0x1264   :  { %v2063_v48 = vadd.f32 %v2061_v46, %v2060_v47 }
0x1266   :  { %2087 = vmatpush.msra.mxu2 %v2063_v48 }
0x1268   :  { %2088 = vmatpush.msra.mxu2 %v2062_v61 }
0x1269   :  { %2304 = vmatmul.msk.f32.vlgmr.msra.gmra.mxu2 %vm356_vm13, %v2069_v33 }
0x12ec   :  { %v2090_v53 = vpop.f32.mrf.mxu2 }
0x12ed   :  { %v2094_v54 = vsel %vm2093_vm5, %v2090_v53, 0.0 }
0x12ee   :  { %2095 = vadd.xlane.f32.xlu2 %v2094_v54 }
0x1361   :  { %v2096_v29 = vpop.xlane.xlu2 %2095 }
0x1362   :  { %v2097_v16 = vmul.f32 %v2096_v29, %v2567_v45 }
0x1364   :  { %v2098_v56 = vsub.f32 %v2090_v53, %v2097_v16 }
0x1366   :  { %v2099_v49 = vmul.f32 %v2098_v56, %v2098_v56 }
0x1368   :  { %v2100_v58 = vsel %vm2093_vm5, %v2099_v49, 0.0 }
0x1369   :  { %2101 = vadd.xlane.f32.xlu0 %v2100_v58 }
0x13dc   :  { %v2102_v62 = vpop.xlane.xlu0 %2101 }
0x13dd   :  { %v2103_v63 = vmul.f32 %v2102_v62, %v2567_v45 }
0x13df   :  { %v2104_v43 = vadd.f32 1e-06, %v2103_v63 }
0x13e1   :  { %2403 = vrsqrt.f32 %v2104_v43  ;;  %vm2111_vm6 = vweird.f32 %v2104_v43 }
0x13e7   :  { %v2404_v0 = vpop.eup %2403 }
0x13e8   :  { %v2106_v1 = vmul.f32 %v2404_v0, %v2104_v43  ;;  %vm2112_vm13 = vweird.f32 %v2404_v0 }
0x13e9   :  { %vm2113_vm7 = vmor %vm2111_vm6, %vm2112_vm13 }
0x13ea   :  { %v2107_v2 = vmul.f32 %v2404_v0, %v2106_v1 }
0x13ec   :  { %v2108_v4 = vmul.f32 0.5, %v2107_v2 }
0x13ee   :  { %v2109_v6 = vsub.f32 1.5, %v2108_v4 }
0x13f0   :  { %v2110_v8 = vmul.f32 %v2404_v0, %v2109_v6 }
0x13f2   :  { %v2114_v10 = vsel %vm2113_vm7, %v2404_v0, %v2110_v8 }
0x13f3   :  { %v2115_v51 = vmul.f32 %v2114_v10, %v2098_v56 }
0x13f5   :  { %v2117_v45 = vmul.f32 %v2116_v9, %v2115_v51 }
0x13f7   :  { %v2119_v12 = vadd.f32 %v2118_v11, %v2117_v45 }
0x13f9   :  { %2120 = vst.msk [vmem:[%s3118_s9] sm:$0x3] %vm2093_vm5, %v2119_v12  ;;  %2305 = vmatmul.msk.f32.vlgmr.msrb.gmra.mxu0 %vm171_vm2, %v2119_v12  ;;  %vm2161_vm2 = vcmask 123904  }
0x1476   :  { %v2142_v55 = vpop.f32.mrf.mxu0 }
0x1477   :  { %v2143_v14 = vadd.f32 %v2142_v55, %v2121_v13 }
0x1479   :  { %v2145_v15 = vmul.f32 %v2143_v14, %v2143_v14 }
0x147b   :  { %v2146_v17 = vsel %vm2093_vm5, %v2145_v15, 0.0 }
0x147c   :  { %2147 = vadd.xlane.f32.xlu1 %v2146_v17 }
0x14ef   :  { %v2148_v20 = vpop.xlane.xlu1 %2147 }
0x14f0   :  { %v2149_v21 = vmax.f32 %v2148_v20, 1e-24 }
0x14f2   :  { %2405 = vrsqrt.f32 %v2149_v21  ;;  %vm2156_vm9 = vweird.f32 %v2149_v21 }
0x14f8   :  { %v2406_v22 = vpop.eup %2405 }
0x14f9   :  { %v2151_v19 = vmul.f32 %v2406_v22, %v2149_v21  ;;  %vm2157_vm8 = vweird.f32 %v2406_v22 }
0x14fa   :  { %vm2158_vm10 = vmor %vm2156_vm9, %vm2157_vm8 }
0x14fb   :  { %v2152_v25 = vmul.f32 %v2406_v22, %v2151_v19 }
0x14fd   :  { %v2153_v26 = vmul.f32 0.5, %v2152_v25 }
0x14ff   :  { %v2154_v24 = vsub.f32 1.5, %v2153_v26 }
0x1501   :  { %v2155_v28 = vmul.f32 %v2406_v22, %v2154_v24 }
0x1503   :  { %v2159_v27 = vsel %vm2158_vm10, %v2406_v22, %v2155_v28 }
0x1504   :  { %v2160_v31 = vmul.f32 %v2159_v27, %v2143_v14 }
0x1506   :  { %2162 = vst.msk [vmem:[%s3119_s10] sm:$0x3] %vm2161_vm2, %v2160_v31 }

</bundles_post_ra>
